<compile_context>
chip_gen: v6e
topology: v6e:2x2x1
jax: 0.10.0
libtpu: 0.0.40
codegen_flags: <defaults>
</compile_context>

<pallas_src>
import jax
import jax.numpy as jnp
from jax import lax
from jax.experimental import pallas as pl
from jax.experimental.pallas import tpu as pltpu

# ----------------------- model dimensions (scaled-down GPT2) -----------------------
B, S = 2, 8          # batch, sequence
D = 128              # n_embd   (ref: 512)
H = 8                # n_head   (ref: 8)
HD = D // H          # head dim
V = 512              # vocab    (ref: 50000)
L = 6                # n_layer  (ref: 6)
NPOS = 64            # n_positions (ref: 512)
M = B * S            # flattened token dim
TV = 256             # vocab tile for the lm_head (V // TV grid steps)
EPS = 1e-5
NEG = float(jnp.finfo(jnp.float32).min)   # HF GPT2 mask value
SQRT_2_OVER_PI = 0.7978845608028654
INV_SQRT_HD = 1.0 / (HD ** 0.5)

assert D % H == 0 and V % TV == 0 and M % 8 == 0 and D % 128 == 0


# ----------------------------- in-kernel helpers -----------------------------------
def _layernorm(x, w, b):
    mu = jnp.mean(x, axis=-1, keepdims=True)
    var = jnp.mean((x - mu) ** 2, axis=-1, keepdims=True)
    return (x - mu) * lax.rsqrt(var + EPS) * w + b


def _gelu_new(x):
    return 0.5 * x * (1.0 + jnp.tanh(SQRT_2_OVER_PI * (x + 0.044715 * x * x * x)))


# ----------------------- fused 6-layer transformer stack kernel ---------------------
def gpt2_stack_kernel(h0_ref, bias_ref, hmask_ref,
                      ln1w_ref, ln1b_ref, attnw_ref, attnb_ref,
                      projw_ref, projb_ref, ln2w_ref, ln2b_ref,
                      fcw_ref, fcb_ref, mlpw_ref, mlpb_ref,
                      lnfw_ref, lnfb_ref,
                      h_ref):
    l = pl.program_id(0)

    @pl.when(l == 0)
    def _():
        h_ref[...] = h0_ref[...]               # load residual stream once

    x = h_ref[...]                             # [M, D] f32, resident across layers

    # ---- self-attention (pre-LN), all heads batched via block-diagonal masking ----
    hn = _layernorm(x, ln1w_ref[...], ln1b_ref[...])
    qkv = jnp.dot(hn.astype(jnp.bfloat16), attnw_ref[...],
                  preferred_element_type=jnp.float32) + attnb_ref[...]   # [M, 3D] f32
    q = qkv[:, 0:D]
    k = qkv[:, D:2 * D]
    v = qkv[:, 2 * D:3 * D]

    # hmask[h*M + m, d] = 1 iff d belongs to head h -> all per-head contractions as one matmul
    hmask = hmask_ref[...]                                               # [H*M, D] f32
    q_bd = jnp.tile(q, (H, 1)) * hmask                                   # [H*M, D]
    sc = lax.dot_general(q_bd.astype(jnp.bfloat16), k.astype(jnp.bfloat16),
                         (((1,), (1,)), ((), ())),
                         preferred_element_type=jnp.float32)             # [H*M, M]
    sc = sc * INV_SQRT_HD + bias_ref[...]      # causal + padding + cross-sequence bias
    pr = jax.nn.softmax(sc, axis=-1)
    ctx_full = jnp.dot(pr.astype(jnp.bfloat16), v.astype(jnp.bfloat16),
                       preferred_element_type=jnp.float32)               # [H*M, D]
    ctx = jnp.sum((ctx_full * hmask).reshape(H, M, D), axis=0)           # [M, D]
    attn_out = jnp.dot(ctx.astype(jnp.bfloat16), projw_ref[...],
                       preferred_element_type=jnp.float32) + projb_ref[...]
    x = x + attn_out
    # TODO(synk): HF GPT2 applies attn/resid/embedding dropout (p=0.1) in train mode;
    #             omitted (eval semantics).

    # ---- MLP (pre-LN) ----
    hn = _layernorm(x, ln2w_ref[...], ln2b_ref[...])
    ff = jnp.dot(hn.astype(jnp.bfloat16), fcw_ref[...],
                 preferred_element_type=jnp.float32) + fcb_ref[...]
    ff = _gelu_new(ff)
    ff = jnp.dot(ff.astype(jnp.bfloat16), mlpw_ref[...],
                 preferred_element_type=jnp.float32) + mlpb_ref[...]
    h_ref[...] = x + ff

    # final LayerNorm fused into the last layer step
    @pl.when(l == pl.num_programs(0) - 1)
    def _():
        h_ref[...] = _layernorm(h_ref[...], lnfw_ref[...], lnfb_ref[...])


# -------------- tied lm_head, vocab-tiled, with online LSE / CE accumulation --------
def lm_head_kernel(hn_ref, wte_ref, tgt_ref, logits_ref, loss_ref,
                   m_acc, l_acc, p_acc):
    j = pl.program_id(0)

    @pl.when(j == 0)
    def _():
        m_acc[...] = jnp.full_like(m_acc, -jnp.inf)
        l_acc[...] = jnp.zeros_like(l_acc)
        p_acc[...] = jnp.zeros_like(p_acc)
        loss_ref[...] = jnp.zeros_like(loss_ref)

    hn = hn_ref[...].astype(jnp.bfloat16)                        # [M, D] (post ln_f)
    lg = lax.dot_general(hn, wte_ref[...], (((1,), (1,)), ((), ())),
                         preferred_element_type=jnp.float32)     # [M, TV]
    logits_ref[...] = lg

    # tile-local "picked" logit (no full-vocab one-hot)
    tgt = tgt_ref[...]                                           # [M, 1] int32 (-100 = ignore)
    col = lax.broadcasted_iota(jnp.int32, (M, TV), 1) + j * TV
    p_acc[...] += jnp.sum(jnp.where(col == tgt, lg, 0.0), axis=1, keepdims=True)

    # online log-sum-exp
    m_new = jnp.maximum(m_acc[...], jnp.max(lg, axis=1, keepdims=True))
    l_acc[...] = (l_acc[...] * jnp.exp(m_acc[...] - m_new)
                  + jnp.sum(jnp.exp(lg - m_new), axis=1, keepdims=True))
    m_acc[...] = m_new

    @pl.when(j == pl.num_programs(0) - 1)
    def _():
        lse = m_acc[...] + jnp.log(l_acc[...])                   # [M, 1]
        valid = (tgt != -100).astype(jnp.float32)                # [M, 1]
        nll = (lse - p_acc[...]) * valid
        num = jnp.sum(nll, axis=0, keepdims=True)                # (1, 1)
        den = jnp.sum(valid, axis=0, keepdims=True)              # (1, 1)
        loss_ref[...] = num / jnp.maximum(den, 1.0)


# ------------------------------- pallas_call wrappers --------------------------------
_stack_in_specs = [
    pl.BlockSpec((M, D), lambda l: (0, 0)),                 # h0 (resident)
    pl.BlockSpec((H * M, M), lambda l: (0, 0)),             # attention bias (resident)
    pl.BlockSpec((H * M, D), lambda l: (0, 0)),             # head block-diag mask (resident)
    pl.BlockSpec((None, 1, D), lambda l: (l, 0, 0)),        # ln1_w
    pl.BlockSpec((None, 1, D), lambda l: (l, 0, 0)),        # ln1_b
    pl.BlockSpec((None, D, 3 * D), lambda l: (l, 0, 0)),    # attn_w
    pl.BlockSpec((None, 1, 3 * D), lambda l: (l, 0, 0)),    # attn_b
    pl.BlockSpec((None, D, D), lambda l: (l, 0, 0)),        # proj_w
    pl.BlockSpec((None, 1, D), lambda l: (l, 0, 0)),        # proj_b
    pl.BlockSpec((None, 1, D), lambda l: (l, 0, 0)),        # ln2_w
    pl.BlockSpec((None, 1, D), lambda l: (l, 0, 0)),        # ln2_b
    pl.BlockSpec((None, D, 4 * D), lambda l: (l, 0, 0)),    # fc_w
    pl.BlockSpec((None, 1, 4 * D), lambda l: (l, 0, 0)),    # fc_b
    pl.BlockSpec((None, 4 * D, D), lambda l: (l, 0, 0)),    # mlp_w
    pl.BlockSpec((None, 1, D), lambda l: (l, 0, 0)),        # mlp_b
    pl.BlockSpec((1, D), lambda l: (0, 0)),                 # lnf_w (resident)
    pl.BlockSpec((1, D), lambda l: (0, 0)),                 # lnf_b (resident)
]

stack_call = pl.pallas_call(
    gpt2_stack_kernel,
    out_shape=jax.ShapeDtypeStruct((M, D), jnp.float32),
    grid=(L,),
    in_specs=_stack_in_specs,
    out_specs=pl.BlockSpec((M, D), lambda l: (0, 0)),       # resident accumulator
    compiler_params=pltpu.CompilerParams(dimension_semantics=("arbitrary",)),
)

head_call = pl.pallas_call(
    lm_head_kernel,
    out_shape=(jax.ShapeDtypeStruct((M, V), jnp.float32),
               jax.ShapeDtypeStruct((1, 1), jnp.float32)),
    grid=(V // TV,),
    in_specs=[
        pl.BlockSpec((M, D), lambda j: (0, 0)),             # final hidden (post ln_f)
        pl.BlockSpec((TV, D), lambda j: (j, 0)),            # wte vocab tile (tied lm_head)
        pl.BlockSpec((M, 1), lambda j: (0, 0)),             # shifted targets
    ],
    out_specs=(pl.BlockSpec((M, TV), lambda j: (0, j)),
               pl.BlockSpec((1, 1), lambda j: (0, 0))),
    scratch_shapes=[pltpu.VMEM((M, 1), jnp.float32),        # running max
                    pltpu.VMEM((M, 1), jnp.float32),        # running sum-exp
                    pltpu.VMEM((M, 1), jnp.float32)],       # picked target logit
    compiler_params=pltpu.CompilerParams(dimension_semantics=("arbitrary",)),
)


# ---------------------------------- parameters ---------------------------------------
def init_params(key):
    ks = jax.random.split(key, 6)
    w_init = lambda k, shape: (0.02 * jax.random.normal(k, shape)).astype(jnp.bfloat16)
    return {
        'wte': w_init(ks[0], (V, D)),
        'wpe': w_init(ks[1], (NPOS, D)),
        'ln1_w': jnp.ones((L, 1, D), jnp.float32), 'ln1_b': jnp.zeros((L, 1, D), jnp.float32),
        'attn_w': w_init(ks[2], (L, D, 3 * D)),    'attn_b': jnp.zeros((L, 1, 3 * D), jnp.float32),
        'proj_w': w_init(ks[3], (L, D, D)),        'proj_b': jnp.zeros((L, 1, D), jnp.float32),
        'ln2_w': jnp.ones((L, 1, D), jnp.float32), 'ln2_b': jnp.zeros((L, 1, D), jnp.float32),
        'fc_w': w_init(ks[4], (L, D, 4 * D)),      'fc_b': jnp.zeros((L, 1, 4 * D), jnp.float32),
        'mlp_w': w_init(ks[5], (L, 4 * D, D)),     'mlp_b': jnp.zeros((L, 1, D), jnp.float32),
        'lnf_w': jnp.ones((1, D), jnp.float32),    'lnf_b': jnp.zeros((1, D), jnp.float32),
    }


# ------------------------------------ forward ----------------------------------------
@jax.jit
def gptc_forward(params, input_ids, attention_mask, labels):
    """Mirrors GPT2LMHeadModel(input_ids, attention_mask, labels) -> (loss, logits)."""
    # embedding lookup + learned positions (glue: gather stays in plain JAX)
    pos_ids = jnp.arange(S)
    h0 = (params['wte'][input_ids] + params['wpe'][pos_ids]).astype(jnp.float32)
    h0 = h0.reshape(M, D)

    # combined causal + padding (+ cross-sequence) additive bias, tiled over heads:
    # rows index (head, token), columns index key tokens of the flattened [B*S] batch.
    am = attention_mask.astype(jnp.float32).reshape(M)
    tok_b = jnp.arange(M) // S
    tok_s = jnp.arange(M) % S
    allowed = (tok_b[:, None] == tok_b[None, :]) & (tok_s[None, :] <= tok_s[:, None])
    bias_m = jnp.where(allowed, (1.0 - am)[None, :] * NEG, NEG)          # [M, M]
    attn_bias = jnp.tile(bias_m, (H, 1))                                 # [H*M, M]

    # head block-diagonal selector: hmask[h*M+m, d] = (d // HD == h)
    hmask = ((jnp.arange(H * M) // M)[:, None] ==
             (jnp.arange(D) // HD)[None, :]).astype(jnp.float32)         # [H*M, D]

    h_final = stack_call(h0, attn_bias, hmask,
                         params['ln1_w'], params['ln1_b'],
                         params['attn_w'], params['attn_b'],
                         params['proj_w'], params['proj_b'],
                         params['ln2_w'], params['ln2_b'],
                         params['fc_w'], params['fc_b'],
                         params['mlp_w'], params['mlp_b'],
                         params['lnf_w'], params['lnf_b'])

    # pre-shifted LM targets (ignore_index=-100 at the final position of each sequence)
    targets = jnp.concatenate(
        [labels.astype(jnp.int32)[:, 1:], jnp.full((B, 1), -100, jnp.int32)],
        axis=1).reshape(M, 1)

    logits_flat, loss = head_call(h_final, params['wte'], targets)
    return loss[0, 0], logits_flat.reshape(B, S, V)


# -------------------------------------- main ------------------------------------------
if __name__ == "__main__":
    key = jax.random.PRNGKey(0)
    pkey, ikey = jax.random.split(key)
    params = init_params(pkey)

    input_ids = jax.random.randint(ikey, (B, S), 1, V, dtype=jnp.int32)
    attention_mask = jnp.ones((B, S), jnp.float32).at[1, S - 2:].set(0.0)  # pad tail of batch 1
    labels = input_ids                                                     # standard LM labels

    loss, logits = gptc_forward(params, input_ids, attention_mask, labels)
    jax.block_until_ready((loss, logits))
    assert logits.shape == (B, S, V) and loss.shape == ()
    assert bool(jnp.isfinite(loss))
    print("KERNEL_OK")
</pallas_src>

<mosaic_0001>
module attributes {stable_mosaic.version = 11 : i64} {
  func.func @lm_head_kernel(%arg0: i32, %arg1: memref<16x128xf32, #tpu.memory_space<vmem>>, %arg2: memref<256x128xbf16, #tpu.memory_space<vmem>>, %arg3: memref<16x1xi32, #tpu.memory_space<vmem>>, %arg4: memref<16x256xf32, #tpu.memory_space<vmem>>, %arg5: memref<1x1xf32, #tpu.memory_space<vmem>>, %arg6: memref<16x1xf32, #tpu.memory_space<vmem>>, %arg7: memref<16x1xf32, #tpu.memory_space<vmem>>, %arg8: memref<16x1xf32, #tpu.memory_space<vmem>>) attributes {dimension_semantics = [#tpu.dimension_semantics<arbitrary>], iteration_bounds = array<i64: 2>, scalar_prefetch = 0 : i64, scratch_operands = 3 : i64, tpu.core_type = #tpu.core_type<tc>, window_params = [{pipeline_mode = #tpu.pipeline_mode<synchronous>, transform_indices = @transform_0, window_bounds = array<i64: 16, 128>}, {transform_indices = @transform_1, window_bounds = array<i64: 256, 128>}, {pipeline_mode = #tpu.pipeline_mode<synchronous>, transform_indices = @transform_2, window_bounds = array<i64: 16, 1>}, {transform_indices = @transform_3, window_bounds = array<i64: 16, 256>}, {pipeline_mode = #tpu.pipeline_mode<synchronous>, transform_indices = @transform_4, window_bounds = array<i64: 1, 1>}]} {
    %c0_i32 = arith.constant 0 : i32
    %0 = arith.cmpi eq, %arg0, %c0_i32 : i32
    %1 = arith.extui %0 : i1 to i32
    %c0_i32_0 = arith.constant 0 : i32
    %2 = arith.cmpi ne, %1, %c0_i32_0 : i32
    scf.if %2 {
      %cst_27 = arith.constant 0xFF800000 : f32
      %42 = vector.broadcast %cst_27 : f32 to vector<16x1xf32>
      %c0_28 = arith.constant 0 : index
      %c0_29 = arith.constant 0 : index
      %43 = vector.load %arg6[%c0_28, %c0_29] : memref<16x1xf32, #tpu.memory_space<vmem>>, vector<16x1xf32>
      tpu.vector_store %arg6[%c0_28, %c0_29], %42 {strides = array<i32>} : memref<16x1xf32, #tpu.memory_space<vmem>>, vector<16x1xf32>,
      %cst_30 = arith.constant 0.000000e+00 : f32
      %44 = vector.broadcast %cst_30 : f32 to vector<16x1xf32>
      %c0_31 = arith.constant 0 : index
      %c0_32 = arith.constant 0 : index
      %45 = vector.load %arg7[%c0_31, %c0_32] : memref<16x1xf32, #tpu.memory_space<vmem>>, vector<16x1xf32>
      tpu.vector_store %arg7[%c0_31, %c0_32], %44 {strides = array<i32>} : memref<16x1xf32, #tpu.memory_space<vmem>>, vector<16x1xf32>,
      %cst_33 = arith.constant 0.000000e+00 : f32
      %46 = vector.broadcast %cst_33 : f32 to vector<16x1xf32>
      %c0_34 = arith.constant 0 : index
      %c0_35 = arith.constant 0 : index
      %47 = vector.load %arg8[%c0_34, %c0_35] : memref<16x1xf32, #tpu.memory_space<vmem>>, vector<16x1xf32>
      tpu.vector_store %arg8[%c0_34, %c0_35], %46 {strides = array<i32>} : memref<16x1xf32, #tpu.memory_space<vmem>>, vector<16x1xf32>,
      %cst_36 = arith.constant 0.000000e+00 : f32
      %48 = vector.broadcast %cst_36 : f32 to vector<1x1xf32>
      %c0_37 = arith.constant 0 : index
      %c0_38 = arith.constant 0 : index
      %49 = vector.load %arg5[%c0_37, %c0_38] : memref<1x1xf32, #tpu.memory_space<vmem>>, vector<1x1xf32>
      tpu.vector_store %arg5[%c0_37, %c0_38], %48 {strides = array<i32>} : memref<1x1xf32, #tpu.memory_space<vmem>>, vector<1x1xf32>,
    } else {
    }
    %c0 = arith.constant 0 : index
    %c0_1 = arith.constant 0 : index
    %3 = vector.load %arg1[%c0, %c0_1] : memref<16x128xf32, #tpu.memory_space<vmem>>, vector<16x128xf32>
    %4 = arith.truncf %3 : vector<16x128xf32> to vector<16x128xbf16>
    %c0_2 = arith.constant 0 : index
    %c0_3 = arith.constant 0 : index
    %5 = vector.load %arg2[%c0_2, %c0_3] : memref<256x128xbf16, #tpu.memory_space<vmem>>, vector<256x128xbf16>
    %cst = arith.constant dense<0.000000e+00> : vector<16x256xf32>
    %6 = tpu.matmul %4, %5, %cst {dimension_numbers = #tpu.dot_dimension_numbers<[1], [1], [0], [0], [0, 0, 1, 0], [], []>} : vector<16x128xbf16>, vector<256x128xbf16>, vector<16x256xf32> -> vector<16x256xf32>
    %c0_4 = arith.constant 0 : index
    %c0_5 = arith.constant 0 : index
    %7 = vector.load %arg4[%c0_4, %c0_5] : memref<16x256xf32, #tpu.memory_space<vmem>>, vector<16x256xf32>
    tpu.vector_store %arg4[%c0_4, %c0_5], %6 {strides = array<i32>} : memref<16x256xf32, #tpu.memory_space<vmem>>, vector<16x256xf32>,
    %c0_6 = arith.constant 0 : index
    %c0_7 = arith.constant 0 : index
    %8 = vector.load %arg3[%c0_6, %c0_7] : memref<16x1xi32, #tpu.memory_space<vmem>>, vector<16x1xi32>
    %9 = tpu.iota {dimensions = array<i32: 1>} : vector<16x256xi32>
    %c256_i32 = arith.constant 256 : i32
    %10 = arith.muli %arg0, %c256_i32 : i32
    %11 = vector.broadcast %10 : i32 to vector<16x256xi32>
    %12 = arith.addi %9, %11 : vector<16x256xi32>
    %c0_8 = arith.constant 0 : index
    %c0_9 = arith.constant 0 : index
    %13 = vector.load %arg8[%c0_8, %c0_9] : memref<16x1xf32, #tpu.memory_space<vmem>>, vector<16x1xf32>
    %14 = vector.broadcast %8 : vector<16x1xi32> to vector<16x256xi32>
    %15 = arith.cmpi eq, %12, %14 : vector<16x256xi32>
    %cst_10 = arith.constant 0.000000e+00 : f32
    %16 = vector.broadcast %cst_10 : f32 to vector<16x256xf32>
    %17 = arith.select %15, %6, %16 : vector<16x256xi1>, vector<16x256xf32>
    %cst_11 = arith.constant dense<0.000000e+00> : vector<16xf32>
    %18 = vector.multi_reduction <add>, %17, %cst_11 [1] : vector<16x256xf32> to vector<16xf32>
    %19 = vector.shape_cast %18 : vector<16xf32> to vector<16x1xf32>
    %20 = arith.addf %13, %19 : vector<16x1xf32>
    %c0_12 = arith.constant 0 : index
    %c0_13 = arith.constant 0 : index
    %21 = vector.load %arg8[%c0_12, %c0_13] : memref<16x1xf32, #tpu.memory_space<vmem>>, vector<16x1xf32>
    tpu.vector_store %arg8[%c0_12, %c0_13], %20 {strides = array<i32>} : memref<16x1xf32, #tpu.memory_space<vmem>>, vector<16x1xf32>,
    %c0_14 = arith.constant 0 : index
    %c0_15 = arith.constant 0 : index
    %22 = vector.load %arg6[%c0_14, %c0_15] : memref<16x1xf32, #tpu.memory_space<vmem>>, vector<16x1xf32>
    %cst_16 = arith.constant dense<0xFF800000> : vector<16xf32>
    %23 = vector.multi_reduction <maximumf>, %6, %cst_16 [1] : vector<16x256xf32> to vector<16xf32>
    %24 = vector.shape_cast %23 : vector<16xf32> to vector<16x1xf32>
    %25 = arith.maximumf %22, %24 : vector<16x1xf32>
    %c0_17 = arith.constant 0 : index
    %c0_18 = arith.constant 0 : index
    %26 = vector.load %arg7[%c0_17, %c0_18] : memref<16x1xf32, #tpu.memory_space<vmem>>, vector<16x1xf32>
    %c0_19 = arith.constant 0 : index
    %c0_20 = arith.constant 0 : index
    %27 = vector.load %arg6[%c0_19, %c0_20] : memref<16x1xf32, #tpu.memory_space<vmem>>, vector<16x1xf32>
    %28 = arith.subf %27, %25 : vector<16x1xf32>
    %29 = math.exp %28 : vector<16x1xf32>
    %30 = arith.mulf %26, %29 : vector<16x1xf32>
    %31 = vector.broadcast %25 : vector<16x1xf32> to vector<16x256xf32>
    %32 = arith.subf %6, %31 : vector<16x256xf32>
    %33 = math.exp %32 : vector<16x256xf32>
    %cst_21 = arith.constant dense<0.000000e+00> : vector<16xf32>
    %34 = vector.multi_reduction <add>, %33, %cst_21 [1] : vector<16x256xf32> to vector<16xf32>
    %35 = vector.shape_cast %34 : vector<16xf32> to vector<16x1xf32>
    %36 = arith.addf %30, %35 : vector<16x1xf32>
    %c0_22 = arith.constant 0 : index
    %c0_23 = arith.constant 0 : index
    %37 = vector.load %arg7[%c0_22, %c0_23] : memref<16x1xf32, #tpu.memory_space<vmem>>, vector<16x1xf32>
    tpu.vector_store %arg7[%c0_22, %c0_23], %36 {strides = array<i32>} : memref<16x1xf32, #tpu.memory_space<vmem>>, vector<16x1xf32>,
    %c0_24 = arith.constant 0 : index
    %c0_25 = arith.constant 0 : index
    %38 = vector.load %arg6[%c0_24, %c0_25] : memref<16x1xf32, #tpu.memory_space<vmem>>, vector<16x1xf32>
    tpu.vector_store %arg6[%c0_24, %c0_25], %25 {strides = array<i32>} : memref<16x1xf32, #tpu.memory_space<vmem>>, vector<16x1xf32>,
    %c1_i32 = arith.constant 1 : i32
    %39 = arith.cmpi eq, %arg0, %c1_i32 : i32
    %40 = arith.extui %39 : i1 to i32
    %c0_i32_26 = arith.constant 0 : i32
    %41 = arith.cmpi ne, %40, %c0_i32_26 : i32
    scf.if %41 {
      %c0_27 = arith.constant 0 : index
      %c0_28 = arith.constant 0 : index
      %42 = vector.load %arg6[%c0_27, %c0_28] : memref<16x1xf32, #tpu.memory_space<vmem>>, vector<16x1xf32>
      %c0_29 = arith.constant 0 : index
      %c0_30 = arith.constant 0 : index
      %43 = vector.load %arg7[%c0_29, %c0_30] : memref<16x1xf32, #tpu.memory_space<vmem>>, vector<16x1xf32>
      %44 = math.log %43 : vector<16x1xf32>
      %45 = arith.addf %42, %44 : vector<16x1xf32>
      %c-100_i32 = arith.constant -100 : i32
      %46 = vector.broadcast %c-100_i32 : i32 to vector<16x1xi32>
      %47 = arith.cmpi ne, %8, %46 : vector<16x1xi32>
      %48 = arith.extui %47 : vector<16x1xi1> to vector<16x1xi32>
      %49 = arith.sitofp %48 : vector<16x1xi32> to vector<16x1xf32>
      %c0_31 = arith.constant 0 : index
      %c0_32 = arith.constant 0 : index
      %50 = vector.load %arg8[%c0_31, %c0_32] : memref<16x1xf32, #tpu.memory_space<vmem>>, vector<16x1xf32>
      %51 = arith.subf %45, %50 : vector<16x1xf32>
      %52 = arith.mulf %51, %49 : vector<16x1xf32>
      %cst_33 = arith.constant dense<0.000000e+00> : vector<1xf32>
      %53 = vector.multi_reduction <add>, %52, %cst_33 [0] : vector<16x1xf32> to vector<1xf32>
      %54 = vector.shape_cast %53 : vector<1xf32> to vector<1x1xf32>
      %cst_34 = arith.constant dense<0.000000e+00> : vector<1xf32>
      %55 = vector.multi_reduction <add>, %49, %cst_34 [0] : vector<16x1xf32> to vector<1xf32>
      %56 = vector.shape_cast %55 : vector<1xf32> to vector<1x1xf32>
      %cst_35 = arith.constant 1.000000e+00 : f32
      %57 = vector.broadcast %cst_35 : f32 to vector<1x1xf32>
      %58 = arith.maximumf %56, %57 : vector<1x1xf32>
      %59 = arith.divf %54, %58 : vector<1x1xf32>
      %c0_36 = arith.constant 0 : index
      %c0_37 = arith.constant 0 : index
      %60 = vector.load %arg5[%c0_36, %c0_37] : memref<1x1xf32, #tpu.memory_space<vmem>>, vector<1x1xf32>
      tpu.vector_store %arg5[%c0_36, %c0_37], %59 {strides = array<i32>} : memref<1x1xf32, #tpu.memory_space<vmem>>, vector<1x1xf32>,
    } else {
    }
    return
  }
  func.func @transform_0(%arg0: i32) -> (i32, i32) {
    %c0_i32 = arith.constant 0 : i32
    %c0_i32_0 = arith.constant 0 : i32
    %c0_i32_1 = arith.constant 0 : i32
    return %c0_i32, %c0_i32_0 : i32, i32
  }
  func.func @transform_1(%arg0: i32) -> (i32, i32) {
    %c0_i32 = arith.constant 0 : i32
    %c0_i32_0 = arith.constant 0 : i32
    return %arg0, %c0_i32 : i32, i32
  }
  func.func @transform_2(%arg0: i32) -> (i32, i32) {
    %c0_i32 = arith.constant 0 : i32
    %c0_i32_0 = arith.constant 0 : i32
    %c0_i32_1 = arith.constant 0 : i32
    return %c0_i32, %c0_i32_0 : i32, i32
  }
  func.func @transform_3(%arg0: i32) -> (i32, i32) {
    %c0_i32 = arith.constant 0 : i32
    %c0_i32_0 = arith.constant 0 : i32
    return %c0_i32, %arg0 : i32, i32
  }
  func.func @transform_4(%arg0: i32) -> (i32, i32) {
    %c0_i32 = arith.constant 0 : i32
    %c0_i32_0 = arith.constant 0 : i32
    %c0_i32_1 = arith.constant 0 : i32
    return %c0_i32, %c0_i32_0 : i32, i32
  }
}

module attributes {stable_mosaic.version = 11 : i64} {
  func.func @gpt2_stack_kernel(%arg0: i32, %arg1: memref<16x128xf32, #tpu.memory_space<vmem>>, %arg2: memref<128x16xf32, #tpu.memory_space<vmem>>, %arg3: memref<128x128xf32, #tpu.memory_space<vmem>>, %arg4: memref<1x1x128xf32, #tpu.memory_space<vmem>>, %arg5: memref<1x1x128xf32, #tpu.memory_space<vmem>>, %arg6: memref<1x128x384xbf16, #tpu.memory_space<vmem>>, %arg7: memref<1x1x384xf32, #tpu.memory_space<vmem>>, %arg8: memref<1x128x128xbf16, #tpu.memory_space<vmem>>, %arg9: memref<1x1x128xf32, #tpu.memory_space<vmem>>, %arg10: memref<1x1x128xf32, #tpu.memory_space<vmem>>, %arg11: memref<1x1x128xf32, #tpu.memory_space<vmem>>, %arg12: memref<1x128x512xbf16, #tpu.memory_space<vmem>>, %arg13: memref<1x1x512xf32, #tpu.memory_space<vmem>>, %arg14: memref<1x512x128xbf16, #tpu.memory_space<vmem>>, %arg15: memref<1x1x128xf32, #tpu.memory_space<vmem>>, %arg16: memref<1x128xf32, #tpu.memory_space<vmem>>, %arg17: memref<1x128xf32, #tpu.memory_space<vmem>>, %arg18: memref<16x128xf32, #tpu.memory_space<vmem>>) attributes {dimension_semantics = [#tpu.dimension_semantics<arbitrary>], iteration_bounds = array<i64: 6>, scalar_prefetch = 0 : i64, scratch_operands = 0 : i64, tpu.core_type = #tpu.core_type<tc>, window_params = [{pipeline_mode = #tpu.pipeline_mode<synchronous>, transform_indices = @transform_0, window_bounds = array<i64: 16, 128>}, {pipeline_mode = #tpu.pipeline_mode<synchronous>, transform_indices = @transform_1, window_bounds = array<i64: 128, 16>}, {pipeline_mode = #tpu.pipeline_mode<synchronous>, transform_indices = @transform_2, window_bounds = array<i64: 128, 128>}, {transform_indices = @transform_3, window_bounds = array<i64: 1, 1, 128>}, {transform_indices = @transform_4, window_bounds = array<i64: 1, 1, 128>}, {transform_indices = @transform_5, window_bounds = array<i64: 1, 128, 384>}, {transform_indices = @transform_6, window_bounds = array<i64: 1, 1, 384>}, {transform_indices = @transform_7, window_bounds = array<i64: 1, 128, 128>}, {transform_indices = @transform_8, window_bounds = array<i64: 1, 1, 128>}, {transform_indices = @transform_9, window_bounds = array<i64: 1, 1, 128>}, {transform_indices = @transform_10, window_bounds = array<i64: 1, 1, 128>}, {transform_indices = @transform_11, window_bounds = array<i64: 1, 128, 512>}, {transform_indices = @transform_12, window_bounds = array<i64: 1, 1, 512>}, {transform_indices = @transform_13, window_bounds = array<i64: 1, 512, 128>}, {transform_indices = @transform_14, window_bounds = array<i64: 1, 1, 128>}, {pipeline_mode = #tpu.pipeline_mode<synchronous>, transform_indices = @transform_15, window_bounds = array<i64: 1, 128>}, {pipeline_mode = #tpu.pipeline_mode<synchronous>, transform_indices = @transform_16, window_bounds = array<i64: 1, 128>}, {pipeline_mode = #tpu.pipeline_mode<synchronous>, transform_indices = @transform_17, window_bounds = array<i64: 16, 128>}]} {
    %c0_i32 = arith.constant 0 : i32
    %0 = arith.cmpi eq, %arg0, %c0_i32 : i32
    %1 = arith.extui %0 : i1 to i32
    %c0_i32_0 = arith.constant 0 : i32
    %2 = arith.cmpi ne, %1, %c0_i32_0 : i32
    scf.if %2 {
      %c0_69 = arith.constant 0 : index
      %c0_70 = arith.constant 0 : index
      %137 = vector.load %arg1[%c0_69, %c0_70] : memref<16x128xf32, #tpu.memory_space<vmem>>, vector<16x128xf32>
      %c0_71 = arith.constant 0 : index
      %c0_72 = arith.constant 0 : index
      %138 = vector.load %arg18[%c0_71, %c0_72] : memref<16x128xf32, #tpu.memory_space<vmem>>, vector<16x128xf32>
      tpu.vector_store %arg18[%c0_71, %c0_72], %137 {strides = array<i32>} : memref<16x128xf32, #tpu.memory_space<vmem>>, vector<16x128xf32>,
    } else {
    }
    %c0 = arith.constant 0 : index
    %c0_1 = arith.constant 0 : index
    %3 = vector.load %arg18[%c0, %c0_1] : memref<16x128xf32, #tpu.memory_space<vmem>>, vector<16x128xf32>
    %c0_2 = arith.constant 0 : index
    %c0_3 = arith.constant 0 : index
    %c0_4 = arith.constant 0 : index
    %4 = vector.load %arg4[%c0_2, %c0_3, %c0_4] : memref<1x1x128xf32, #tpu.memory_space<vmem>>, vector<1x1x128xf32>
    %5 = vector.shape_cast %4 : vector<1x1x128xf32> to vector<1x128xf32>
    %c0_5 = arith.constant 0 : index
    %c0_6 = arith.constant 0 : index
    %c0_7 = arith.constant 0 : index
    %6 = vector.load %arg5[%c0_5, %c0_6, %c0_7] : memref<1x1x128xf32, #tpu.memory_space<vmem>>, vector<1x1x128xf32>
    %7 = vector.shape_cast %6 : vector<1x1x128xf32> to vector<1x128xf32>
    %cst = arith.constant dense<0.000000e+00> : vector<16xf32>
    %8 = vector.multi_reduction <add>, %3, %cst [1] : vector<16x128xf32> to vector<16xf32>
    %9 = vector.shape_cast %8 : vector<16xf32> to vector<16x1xf32>
    %cst_8 = arith.constant 1.280000e+02 : f32
    %10 = vector.broadcast %cst_8 : f32 to vector<16x1xf32>
    %11 = arith.divf %9, %10 : vector<16x1xf32>
    %12 = vector.broadcast %11 : vector<16x1xf32> to vector<16x128xf32>
    %13 = arith.subf %3, %12 : vector<16x128xf32>
    %14 = arith.mulf %13, %13 : vector<16x128xf32>
    %cst_9 = arith.constant dense<0.000000e+00> : vector<16xf32>
    %15 = vector.multi_reduction <add>, %14, %cst_9 [1] : vector<16x128xf32> to vector<16xf32>
    %16 = vector.shape_cast %15 : vector<16xf32> to vector<16x1xf32>
    %cst_10 = arith.constant 1.280000e+02 : f32
    %17 = vector.broadcast %cst_10 : f32 to vector<16x1xf32>
    %18 = arith.divf %16, %17 : vector<16x1xf32>
    %19 = vector.broadcast %11 : vector<16x1xf32> to vector<16x128xf32>
    %20 = arith.subf %3, %19 : vector<16x128xf32>
    %cst_11 = arith.constant 9.99999974E-6 : f32
    %21 = vector.broadcast %cst_11 : f32 to vector<16x1xf32>
    %22 = arith.addf %18, %21 : vector<16x1xf32>
    %23 = math.rsqrt %22 : vector<16x1xf32>
    %24 = vector.broadcast %23 : vector<16x1xf32> to vector<16x128xf32>
    %25 = arith.mulf %20, %24 : vector<16x128xf32>
    %26 = vector.broadcast %5 : vector<1x128xf32> to vector<16x128xf32>
    %27 = arith.mulf %25, %26 : vector<16x128xf32>
    %28 = vector.broadcast %7 : vector<1x128xf32> to vector<16x128xf32>
    %29 = arith.addf %27, %28 : vector<16x128xf32>
    %30 = arith.truncf %29 : vector<16x128xf32> to vector<16x128xbf16>
    %c0_12 = arith.constant 0 : index
    %c0_13 = arith.constant 0 : index
    %c0_14 = arith.constant 0 : index
    %31 = vector.load %arg6[%c0_12, %c0_13, %c0_14] : memref<1x128x384xbf16, #tpu.memory_space<vmem>>, vector<1x128x384xbf16>
    %32 = vector.shape_cast %31 : vector<1x128x384xbf16> to vector<128x384xbf16>
    %cst_15 = arith.constant dense<0.000000e+00> : vector<16x384xf32>
    %33 = tpu.matmul %30, %32, %cst_15 {dimension_numbers = #tpu.dot_dimension_numbers<[1], [0], [0], [1], [0, 0, 1, 1], [], []>} : vector<16x128xbf16>, vector<128x384xbf16>, vector<16x384xf32> -> vector<16x384xf32>
    %c0_16 = arith.constant 0 : index
    %c0_17 = arith.constant 0 : index
    %c0_18 = arith.constant 0 : index
    %34 = vector.load %arg7[%c0_16, %c0_17, %c0_18] : memref<1x1x384xf32, #tpu.memory_space<vmem>>, vector<1x1x384xf32>
    %35 = vector.shape_cast %34 : vector<1x1x384xf32> to vector<1x384xf32>
    %36 = vector.broadcast %35 : vector<1x384xf32> to vector<16x384xf32>
    %37 = arith.addf %33, %36 : vector<16x384xf32>
    %38 = vector.extract_strided_slice %37 {offsets = [0, 0], sizes = [16, 128], strides = [1, 1]} : vector<16x384xf32> to vector<16x128xf32>
    %39 = vector.extract_strided_slice %37 {offsets = [0, 128], sizes = [16, 128], strides = [1, 1]} : vector<16x384xf32> to vector<16x128xf32>
    %40 = vector.extract_strided_slice %37 {offsets = [0, 256], sizes = [16, 128], strides = [1, 1]} : vector<16x384xf32> to vector<16x128xf32>
    %c0_19 = arith.constant 0 : index
    %c0_20 = arith.constant 0 : index
    %41 = vector.load %arg3[%c0_19, %c0_20] : memref<128x128xf32, #tpu.memory_space<vmem>>, vector<128x128xf32>
    %42 = tpu.concatenate %38, %38, %38, %38, %38, %38, %38, %38 in 0 : vector<16x128xf32>, vector<16x128xf32>, vector<16x128xf32>, vector<16x128xf32>, vector<16x128xf32>, vector<16x128xf32>, vector<16x128xf32>, vector<16x128xf32> -> vector<128x128xf32>
    %43 = arith.mulf %42, %41 : vector<128x128xf32>
    %44 = arith.truncf %43 : vector<128x128xf32> to vector<128x128xbf16>
    %45 = arith.truncf %39 : vector<16x128xf32> to vector<16x128xbf16>
    %cst_21 = arith.constant dense<0.000000e+00> : vector<128x16xf32>
    %46 = tpu.matmul %44, %45, %cst_21 {dimension_numbers = #tpu.dot_dimension_numbers<[1], [1], [0], [0], [0, 0, 1, 0], [], []>} : vector<128x128xbf16>, vector<16x128xbf16>, vector<128x16xf32> -> vector<128x16xf32>
    %cst_22 = arith.constant 2.500000e-01 : f32
    %47 = vector.broadcast %cst_22 : f32 to vector<128x16xf32>
    %48 = arith.mulf %46, %47 : vector<128x16xf32>
    %c0_23 = arith.constant 0 : index
    %c0_24 = arith.constant 0 : index
    %49 = vector.load %arg2[%c0_23, %c0_24] : memref<128x16xf32, #tpu.memory_space<vmem>>, vector<128x16xf32>
    %50 = arith.addf %48, %49 : vector<128x16xf32>
    %cst_25 = arith.constant dense<0xFF800000> : vector<128xf32>
    %51 = vector.multi_reduction <maximumf>, %50, %cst_25 [1] : vector<128x16xf32> to vector<128xf32>
    %cst_26 = arith.constant 0xFF800000 : f32
    %52 = vector.broadcast %cst_26 : f32 to vector<128xf32>
    %53 = arith.maximumf %52, %51 : vector<128xf32>
    %54 = vector.shape_cast %53 : vector<128xf32> to vector<128x1xf32>
    %55 = vector.broadcast %54 : vector<128x1xf32> to vector<128x16xf32>
    %56 = arith.subf %50, %55 : vector<128x16xf32>
    %57 = math.exp %56 : vector<128x16xf32>
    %cst_27 = arith.constant dense<0.000000e+00> : vector<128xf32>
    %58 = vector.multi_reduction <add>, %57, %cst_27 [1] : vector<128x16xf32> to vector<128xf32>
    %59 = vector.shape_cast %58 : vector<128xf32> to vector<128x1xf32>
    %60 = vector.broadcast %59 : vector<128x1xf32> to vector<128x16xf32>
    %61 = arith.divf %57, %60 : vector<128x16xf32>
    %62 = arith.truncf %61 : vector<128x16xf32> to vector<128x16xbf16>
    %63 = arith.truncf %40 : vector<16x128xf32> to vector<16x128xbf16>
    %cst_28 = arith.constant dense<0.000000e+00> : vector<128x128xf32>
    %64 = tpu.matmul %62, %63, %cst_28 {dimension_numbers = #tpu.dot_dimension_numbers<[1], [0], [0], [1], [0, 0, 1, 1], [], []>} : vector<128x16xbf16>, vector<16x128xbf16>, vector<128x128xf32> -> vector<128x128xf32>
    %65 = arith.mulf %64, %41 : vector<128x128xf32>
    %66 = vector.shape_cast %65 : vector<128x128xf32> to vector<8x16x128xf32>
    %cst_29 = arith.constant dense<0.000000e+00> : vector<16x128xf32>
    %67 = vector.multi_reduction <add>, %66, %cst_29 [0] : vector<8x16x128xf32> to vector<16x128xf32>
    %68 = arith.truncf %67 : vector<16x128xf32> to vector<16x128xbf16>
    %c0_30 = arith.constant 0 : index
    %c0_31 = arith.constant 0 : index
    %c0_32 = arith.constant 0 : index
    %69 = vector.load %arg8[%c0_30, %c0_31, %c0_32] : memref<1x128x128xbf16, #tpu.memory_space<vmem>>, vector<1x128x128xbf16>
    %70 = vector.shape_cast %69 : vector<1x128x128xbf16> to vector<128x128xbf16>
    %cst_33 = arith.constant dense<0.000000e+00> : vector<16x128xf32>
    %71 = tpu.matmul %68, %70, %cst_33 {dimension_numbers = #tpu.dot_dimension_numbers<[1], [0], [0], [1], [0, 0, 1, 1], [], []>} : vector<16x128xbf16>, vector<128x128xbf16>, vector<16x128xf32> -> vector<16x128xf32>
    %c0_34 = arith.constant 0 : index
    %c0_35 = arith.constant 0 : index
    %c0_36 = arith.constant 0 : index
    %72 = vector.load %arg9[%c0_34, %c0_35, %c0_36] : memref<1x1x128xf32, #tpu.memory_space<vmem>>, vector<1x1x128xf32>
    %73 = vector.shape_cast %72 : vector<1x1x128xf32> to vector<1x128xf32>
    %74 = vector.broadcast %73 : vector<1x128xf32> to vector<16x128xf32>
    %75 = arith.addf %71, %74 : vector<16x128xf32>
    %76 = arith.addf %3, %75 : vector<16x128xf32>
    %c0_37 = arith.constant 0 : index
    %c0_38 = arith.constant 0 : index
    %c0_39 = arith.constant 0 : index
    %77 = vector.load %arg10[%c0_37, %c0_38, %c0_39] : memref<1x1x128xf32, #tpu.memory_space<vmem>>, vector<1x1x128xf32>
    %78 = vector.shape_cast %77 : vector<1x1x128xf32> to vector<1x128xf32>
    %c0_40 = arith.constant 0 : index
    %c0_41 = arith.constant 0 : index
    %c0_42 = arith.constant 0 : index
    %79 = vector.load %arg11[%c0_40, %c0_41, %c0_42] : memref<1x1x128xf32, #tpu.memory_space<vmem>>, vector<1x1x128xf32>
    %80 = vector.shape_cast %79 : vector<1x1x128xf32> to vector<1x128xf32>
    %cst_43 = arith.constant dense<0.000000e+00> : vector<16xf32>
    %81 = vector.multi_reduction <add>, %76, %cst_43 [1] : vector<16x128xf32> to vector<16xf32>
    %82 = vector.shape_cast %81 : vector<16xf32> to vector<16x1xf32>
    %cst_44 = arith.constant 1.280000e+02 : f32
    %83 = vector.broadcast %cst_44 : f32 to vector<16x1xf32>
    %84 = arith.divf %82, %83 : vector<16x1xf32>
    %85 = vector.broadcast %84 : vector<16x1xf32> to vector<16x128xf32>
    %86 = arith.subf %76, %85 : vector<16x128xf32>
    %87 = arith.mulf %86, %86 : vector<16x128xf32>
    %cst_45 = arith.constant dense<0.000000e+00> : vector<16xf32>
    %88 = vector.multi_reduction <add>, %87, %cst_45 [1] : vector<16x128xf32> to vector<16xf32>
    %89 = vector.shape_cast %88 : vector<16xf32> to vector<16x1xf32>
    %cst_46 = arith.constant 1.280000e+02 : f32
    %90 = vector.broadcast %cst_46 : f32 to vector<16x1xf32>
    %91 = arith.divf %89, %90 : vector<16x1xf32>
    %92 = vector.broadcast %84 : vector<16x1xf32> to vector<16x128xf32>
    %93 = arith.subf %76, %92 : vector<16x128xf32>
    %cst_47 = arith.constant 9.99999974E-6 : f32
    %94 = vector.broadcast %cst_47 : f32 to vector<16x1xf32>
    %95 = arith.addf %91, %94 : vector<16x1xf32>
    %96 = math.rsqrt %95 : vector<16x1xf32>
    %97 = vector.broadcast %96 : vector<16x1xf32> to vector<16x128xf32>
    %98 = arith.mulf %93, %97 : vector<16x128xf32>
    %99 = vector.broadcast %78 : vector<1x128xf32> to vector<16x128xf32>
    %100 = arith.mulf %98, %99 : vector<16x128xf32>
    %101 = vector.broadcast %80 : vector<1x128xf32> to vector<16x128xf32>
    %102 = arith.addf %100, %101 : vector<16x128xf32>
    %103 = arith.truncf %102 : vector<16x128xf32> to vector<16x128xbf16>
    %c0_48 = arith.constant 0 : index
    %c0_49 = arith.constant 0 : index
    %c0_50 = arith.constant 0 : index
    %104 = vector.load %arg12[%c0_48, %c0_49, %c0_50] : memref<1x128x512xbf16, #tpu.memory_space<vmem>>, vector<1x128x512xbf16>
    %105 = vector.shape_cast %104 : vector<1x128x512xbf16> to vector<128x512xbf16>
    %cst_51 = arith.constant dense<0.000000e+00> : vector<16x512xf32>
    %106 = tpu.matmul %103, %105, %cst_51 {dimension_numbers = #tpu.dot_dimension_numbers<[1], [0], [0], [1], [0, 0, 1, 1], [], []>} : vector<16x128xbf16>, vector<128x512xbf16>, vector<16x512xf32> -> vector<16x512xf32>
    %c0_52 = arith.constant 0 : index
    %c0_53 = arith.constant 0 : index
    %c0_54 = arith.constant 0 : index
    %107 = vector.load %arg13[%c0_52, %c0_53, %c0_54] : memref<1x1x512xf32, #tpu.memory_space<vmem>>, vector<1x1x512xf32>
    %108 = vector.shape_cast %107 : vector<1x1x512xf32> to vector<1x512xf32>
    %109 = vector.broadcast %108 : vector<1x512xf32> to vector<16x512xf32>
    %110 = arith.addf %106, %109 : vector<16x512xf32>
    %cst_55 = arith.constant 5.000000e-01 : f32
    %111 = vector.broadcast %cst_55 : f32 to vector<16x512xf32>
    %112 = arith.mulf %111, %110 : vector<16x512xf32>
    %cst_56 = arith.constant 4.471500e-02 : f32
    %113 = vector.broadcast %cst_56 : f32 to vector<16x512xf32>
    %114 = arith.mulf %113, %110 : vector<16x512xf32>
    %115 = arith.mulf %114, %110 : vector<16x512xf32>
    %116 = arith.mulf %115, %110 : vector<16x512xf32>
    %117 = arith.addf %110, %116 : vector<16x512xf32>
    %cst_57 = arith.constant 0.797884583 : f32
    %118 = vector.broadcast %cst_57 : f32 to vector<16x512xf32>
    %119 = arith.mulf %118, %117 : vector<16x512xf32>
    %120 = math.tanh %119 : vector<16x512xf32>
    %cst_58 = arith.constant 1.000000e+00 : f32
    %121 = vector.broadcast %cst_58 : f32 to vector<16x512xf32>
    %122 = arith.addf %121, %120 : vector<16x512xf32>
    %123 = arith.mulf %112, %122 : vector<16x512xf32>
    %124 = arith.truncf %123 : vector<16x512xf32> to vector<16x512xbf16>
    %c0_59 = arith.constant 0 : index
    %c0_60 = arith.constant 0 : index
    %c0_61 = arith.constant 0 : index
    %125 = vector.load %arg14[%c0_59, %c0_60, %c0_61] : memref<1x512x128xbf16, #tpu.memory_space<vmem>>, vector<1x512x128xbf16>
    %126 = vector.shape_cast %125 : vector<1x512x128xbf16> to vector<512x128xbf16>
    %cst_62 = arith.constant dense<0.000000e+00> : vector<16x128xf32>
    %127 = tpu.matmul %124, %126, %cst_62 {dimension_numbers = #tpu.dot_dimension_numbers<[1], [0], [0], [1], [0, 0, 1, 1], [], []>} : vector<16x512xbf16>, vector<512x128xbf16>, vector<16x128xf32> -> vector<16x128xf32>
    %c0_63 = arith.constant 0 : index
    %c0_64 = arith.constant 0 : index
    %c0_65 = arith.constant 0 : index
    %128 = vector.load %arg15[%c0_63, %c0_64, %c0_65] : memref<1x1x128xf32, #tpu.memory_space<vmem>>, vector<1x1x128xf32>
    %129 = vector.shape_cast %128 : vector<1x1x128xf32> to vector<1x128xf32>
    %130 = vector.broadcast %129 : vector<1x128xf32> to vector<16x128xf32>
    %131 = arith.addf %127, %130 : vector<16x128xf32>
    %132 = arith.addf %76, %131 : vector<16x128xf32>
    %c0_66 = arith.constant 0 : index
    %c0_67 = arith.constant 0 : index
    %133 = vector.load %arg18[%c0_66, %c0_67] : memref<16x128xf32, #tpu.memory_space<vmem>>, vector<16x128xf32>
    tpu.vector_store %arg18[%c0_66, %c0_67], %132 {strides = array<i32>} : memref<16x128xf32, #tpu.memory_space<vmem>>, vector<16x128xf32>,
    %c5_i32 = arith.constant 5 : i32
    %134 = arith.cmpi eq, %arg0, %c5_i32 : i32
    %135 = arith.extui %134 : i1 to i32
    %c0_i32_68 = arith.constant 0 : i32
    %136 = arith.cmpi ne, %135, %c0_i32_68 : i32
    scf.if %136 {
      %c0_69 = arith.constant 0 : index
      %c0_70 = arith.constant 0 : index
      %137 = vector.load %arg18[%c0_69, %c0_70] : memref<16x128xf32, #tpu.memory_space<vmem>>, vector<16x128xf32>
      %c0_71 = arith.constant 0 : index
      %c0_72 = arith.constant 0 : index
      %138 = vector.load %arg16[%c0_71, %c0_72] : memref<1x128xf32, #tpu.memory_space<vmem>>, vector<1x128xf32>
      %c0_73 = arith.constant 0 : index
      %c0_74 = arith.constant 0 : index
      %139 = vector.load %arg17[%c0_73, %c0_74] : memref<1x128xf32, #tpu.memory_space<vmem>>, vector<1x128xf32>
      %cst_75 = arith.constant dense<0.000000e+00> : vector<16xf32>
      %140 = vector.multi_reduction <add>, %137, %cst_75 [1] : vector<16x128xf32> to vector<16xf32>
      %141 = vector.shape_cast %140 : vector<16xf32> to vector<16x1xf32>
      %cst_76 = arith.constant 1.280000e+02 : f32
      %142 = vector.broadcast %cst_76 : f32 to vector<16x1xf32>
      %143 = arith.divf %141, %142 : vector<16x1xf32>
      %144 = vector.broadcast %143 : vector<16x1xf32> to vector<16x128xf32>
      %145 = arith.subf %137, %144 : vector<16x128xf32>
      %146 = arith.mulf %145, %145 : vector<16x128xf32>
      %cst_77 = arith.constant dense<0.000000e+00> : vector<16xf32>
      %147 = vector.multi_reduction <add>, %146, %cst_77 [1] : vector<16x128xf32> to vector<16xf32>
      %148 = vector.shape_cast %147 : vector<16xf32> to vector<16x1xf32>
      %cst_78 = arith.constant 1.280000e+02 : f32
      %149 = vector.broadcast %cst_78 : f32 to vector<16x1xf32>
      %150 = arith.divf %148, %149 : vector<16x1xf32>
      %151 = vector.broadcast %143 : vector<16x1xf32> to vector<16x128xf32>
      %152 = arith.subf %137, %151 : vector<16x128xf32>
      %cst_79 = arith.constant 9.99999974E-6 : f32
      %153 = vector.broadcast %cst_79 : f32 to vector<16x1xf32>
      %154 = arith.addf %150, %153 : vector<16x1xf32>
      %155 = math.rsqrt %154 : vector<16x1xf32>
      %156 = vector.broadcast %155 : vector<16x1xf32> to vector<16x128xf32>
      %157 = arith.mulf %152, %156 : vector<16x128xf32>
      %158 = vector.broadcast %138 : vector<1x128xf32> to vector<16x128xf32>
      %159 = arith.mulf %157, %158 : vector<16x128xf32>
      %160 = vector.broadcast %139 : vector<1x128xf32> to vector<16x128xf32>
      %161 = arith.addf %159, %160 : vector<16x128xf32>
      %c0_80 = arith.constant 0 : index
      %c0_81 = arith.constant 0 : index
      %162 = vector.load %arg18[%c0_80, %c0_81] : memref<16x128xf32, #tpu.memory_space<vmem>>, vector<16x128xf32>
      tpu.vector_store %arg18[%c0_80, %c0_81], %161 {strides = array<i32>} : memref<16x128xf32, #tpu.memory_space<vmem>>, vector<16x128xf32>,
    } else {
    }
    return
  }
  func.func @transform_0(%arg0: i32) -> (i32, i32) {
    %c0_i32 = arith.constant 0 : i32
    %c0_i32_0 = arith.constant 0 : i32
    %c0_i32_1 = arith.constant 0 : i32
    return %c0_i32, %c0_i32_0 : i32, i32
  }
  func.func @transform_1(%arg0: i32) -> (i32, i32) {
    %c0_i32 = arith.constant 0 : i32
    %c0_i32_0 = arith.constant 0 : i32
    %c0_i32_1 = arith.constant 0 : i32
    return %c0_i32, %c0_i32_0 : i32, i32
  }
  func.func @transform_2(%arg0: i32) -> (i32, i32) {
    %c0_i32 = arith.constant 0 : i32
    %c0_i32_0 = arith.constant 0 : i32
    %c0_i32_1 = arith.constant 0 : i32
    return %c0_i32, %c0_i32_0 : i32, i32
  }
  func.func @transform_3(%arg0: i32) -> (i32, i32, i32) {
    %c0_i32 = arith.constant 0 : i32
    %c0_i32_0 = arith.constant 0 : i32
    %c0_i32_1 = arith.constant 0 : i32
    return %arg0, %c0_i32, %c0_i32_0 : i32, i32, i32
  }
  func.func @transform_4(%arg0: i32) -> (i32, i32, i32) {
    %c0_i32 = arith.constant 0 : i32
    %c0_i32_0 = arith.constant 0 : i32
    %c0_i32_1 = arith.constant 0 : i32
    return %arg0, %c0_i32, %c0_i32_0 : i32, i32, i32
  }
  func.func @transform_5(%arg0: i32) -> (i32, i32, i32) {
    %c0_i32 = arith.constant 0 : i32
    %c0_i32_0 = arith.constant 0 : i32
    %c0_i32_1 = arith.constant 0 : i32
    return %arg0, %c0_i32, %c0_i32_0 : i32, i32, i32
  }
  func.func @transform_6(%arg0: i32) -> (i32, i32, i32) {
    %c0_i32 = arith.constant 0 : i32
    %c0_i32_0 = arith.constant 0 : i32
    %c0_i32_1 = arith.constant 0 : i32
    return %arg0, %c0_i32, %c0_i32_0 : i32, i32, i32
  }
  func.func @transform_7(%arg0: i32) -> (i32, i32, i32) {
    %c0_i32 = arith.constant 0 : i32
    %c0_i32_0 = arith.constant 0 : i32
    %c0_i32_1 = arith.constant 0 : i32
    return %arg0, %c0_i32, %c0_i32_0 : i32, i32, i32
  }
  func.func @transform_8(%arg0: i32) -> (i32, i32, i32) {
    %c0_i32 = arith.constant 0 : i32
    %c0_i32_0 = arith.constant 0 : i32
    %c0_i32_1 = arith.constant 0 : i32
    return %arg0, %c0_i32, %c0_i32_0 : i32, i32, i32
  }
  func.func @transform_9(%arg0: i32) -> (i32, i32, i32) {
    %c0_i32 = arith.constant 0 : i32
    %c0_i32_0 = arith.constant 0 : i32
    %c0_i32_1 = arith.constant 0 : i32
    return %arg0, %c0_i32, %c0_i32_0 : i32, i32, i32
  }
  func.func @transform_10(%arg0: i32) -> (i32, i32, i32) {
    %c0_i32 = arith.constant 0 : i32
    %c0_i32_0 = arith.constant 0 : i32
    %c0_i32_1 = arith.constant 0 : i32
    return %arg0, %c0_i32, %c0_i32_0 : i32, i32, i32
  }
  func.func @transform_11(%arg0: i32) -> (i32, i32, i32) {
    %c0_i32 = arith.constant 0 : i32
    %c0_i32_0 = arith.constant 0 : i32
    %c0_i32_1 = arith.constant 0 : i32
    return %arg0, %c0_i32, %c0_i32_0 : i32, i32, i32
  }
  func.func @transform_12(%arg0: i32) -> (i32, i32, i32) {
    %c0_i32 = arith.constant 0 : i32
    %c0_i32_0 = arith.constant 0 : i32
    %c0_i32_1 = arith.constant 0 : i32
    return %arg0, %c0_i32, %c0_i32_0 : i32, i32, i32
  }
  func.func @transform_13(%arg0: i32) -> (i32, i32, i32) {
    %c0_i32 = arith.constant 0 : i32
    %c0_i32_0 = arith.constant 0 : i32
    %c0_i32_1 = arith.constant 0 : i32
    return %arg0, %c0_i32, %c0_i32_0 : i32, i32, i32
  }
  func.func @transform_14(%arg0: i32) -> (i32, i32, i32) {
    %c0_i32 = arith.constant 0 : i32
    %c0_i32_0 = arith.constant 0 : i32
    %c0_i32_1 = arith.constant 0 : i32
    return %arg0, %c0_i32, %c0_i32_0 : i32, i32, i32
  }
  func.func @transform_15(%arg0: i32) -> (i32, i32) {
    %c0_i32 = arith.constant 0 : i32
    %c0_i32_0 = arith.constant 0 : i32
    %c0_i32_1 = arith.constant 0 : i32
    return %c0_i32, %c0_i32_0 : i32, i32
  }
  func.func @transform_16(%arg0: i32) -> (i32, i32) {
    %c0_i32 = arith.constant 0 : i32
    %c0_i32_0 = arith.constant 0 : i32
    %c0_i32_1 = arith.constant 0 : i32
    return %c0_i32, %c0_i32_0 : i32, i32
  }
  func.func @transform_17(%arg0: i32) -> (i32, i32) {
    %c0_i32 = arith.constant 0 : i32
    %c0_i32_0 = arith.constant 0 : i32
    %c0_i32_1 = arith.constant 0 : i32
    return %c0_i32, %c0_i32_0 : i32, i32
  }
}

</mosaic_0001>

<bundles_post_ra>
// kernel: gptc_forward.3
= control target key start
LH: loop header
LB: loop body
LE: loop exit
PB: predicated region body
PF: predicated region fallthrough
CT: control target
= control target key end

     0   :  { %10 = vsyncpa [#allocation6], 0  ;;  %s1073_s0 = inlined_call_operand.vmem [shape: f32[16,128], index: 0, kind: input, shape index: {}]   ;;  %s1074_s1 = inlined_call_operand.vmem [shape: bf16[512,128], index: 1, kind: input, shape index: {}]   ;;  %s1075_s2 = inlined_call_operand.vmem [shape: s32[16,1], index: 2, kind: input, shape index: {}]   ;;  %s1076_s3 = inlined_call_operand.hbm [shape: f32[16,512], index: 3, kind: output, shape index: {0}]   ;;  %s1077_s4 = inlined_call_operand.hbm [shape: f32[1,1], index: 4, kind: output, shape index: {1}]  }
   0x1   :  { %12 = vsyncpa [#allocation6 + $0x1], 0 }
   0x2   :  { %13 = vsyncpa [#allocation8], 0  ;;  %s894_s15 = smov 0   ;;  %s896_s16 = smov 0  }
   0x3   :  { %s898_s17 = smov 0   ;;  %s900_s18 = smov 0  }
   0x4 LB: > { %s915_s19 = sadd.s32 4294967295, %s858_s18   ;;  %s627_s20 = sadd.s32 4294967294, %s858_s18   ;;  %s858_s18 = sphi %s900_s18, %s1083_s18   ;;  %s854_s17 = sphi %s898_s17, %s1082_s17   ;;  %s850_s16 = sphi %s896_s16, %s1081_s16   ;;  %s846_s15 = sphi %s894_s15, %s1080_s15  }
   0x5   : > { %s919_s21 = sadd.s32 1, %s858_s18   ;;  %s94_s22 = sadd.s32 1, %s854_s17 }
   0x6   : > { %s91_s23 = ssub.s32 %s858_s18, %s919_s21  ;;  %p104_p0 = scmp.ne.s32.totalorder %s854_s17, %s850_s16 }
   0x7   : > { %p92_p1 = scmp.eq.s32.totalorder %s91_s23, 0  ;;  %p105_p2 = scmp.eq.s32.totalorder %s915_s19, 1 }
   0x8   : > { %p110_p3 = scmp.ne.s32.totalorder %s850_s16, %s846_s15  ;;  %p111_p4 = scmp.eq.s32.totalorder %s627_s20, 1 }
   0x9   : > { %s930_s24 = scalar_select %p92_p1, %s854_s17, %s94_s22  }
   0xa   : > { %p934_p5 = por %p105_p2, %p104_p0  ;;  %p938_p6 = por %p111_p4, %p110_p3 }
   0xb   : > { %p630_p7 = scmp.ge.s32.totalorder %s858_s18, 1  ;;  %p165_p8 = scmp.lt.s32.totalorder %s858_s18, 3 }
   0xd   : > { %p166_p9 = pnand %p630_p7, %p165_p8 }
   0xe   : > { %s186_s27 = sand.u32 (!%p166_p9), 1, %s850_s16   ;;  %s632_s28 = sshll.u32 (!%p166_p9), %s915_s19, 5 }
   0xf   : > { %169 = sbr.rel (%p166_p9) target bundleno = 808 (0x328), region = 32  ;;  %s631_s29 = sshll.u32 (!%p166_p9), %s186_s27, 5 }
  0x10   : > { %p192_p10 = scmp.lt.s32.totalorder (!%p166_p9), %s632_s28, 63  ;;  %s953_s8 = scalar_lea.vmem (!%p166_p9), [#allocation5], %s631_s29 }
  0x11   : > { %p634_p11 = scmp.ne.s32.totalorder (!%p166_p9), %s915_s19, 0 }
  0x14   : > { %s1085_s28 = smov (!%p192_p10, %s632_s28), 63  ;;  %202 = sbr.rel (%p634_p11) target bundleno = 30 (0x1e), region = 36 }
  0x15   : > { %s633_s30 = sshll.u32 %s1085_s28, 2 }
  0x16   : > { %s951_s7 = scalar_lea.vmem %s1074_s1, %s633_s30 }
  0x19   : > { %vm203_vm0 = vcmask 7168   ;;  %vm210_vm1 = vcmask 0   ;;  %v860_v0 = vmov -inf   ;;  %v861_v1 = vmov 0.0  }
  0x1a   : > { %204 = vst.msk [vmem:[#allocation2] sm:$0xff] %vm203_vm0, %v860_v0  ;;  %205 = vst.msk [vmem:[#allocation2 + $0x8] sm:$0xff] %vm203_vm0, %v860_v0 }
  0x1b   : > { %206 = vst.msk [vmem:[#allocation3] sm:$0xff] %vm203_vm0, %v861_v1  ;;  %207 = vst.msk [vmem:[#allocation3 + $0x8] sm:$0xff] %vm203_vm0, %v861_v1 }
  0x1c   : > { %208 = vst.msk [vmem:[#allocation4] sm:$0xff] %vm203_vm0, %v861_v1  ;;  %209 = vst.msk [vmem:[#allocation4 + $0x8] sm:$0xff] %vm203_vm0, %v861_v1 }
  0x1d   : > { %211 = vst.msk [vmem:[#allocation7] sm:$0x1] %vm210_vm1, %v861_v1 }
  0x1e PF: > { %v736_v2 = vld [vmem:[%s951_s7 + $0x78] sm:$0xff]   ;;  %v738_v4 = vld [vmem:[%s951_s7 + $0x70] sm:$0xff]   ;;  %v740_v6 = vld [vmem:[%s951_s7 + $0x68] sm:$0xff]   ;;  %v862_v21 = vmov 0   ;;  %vm423_vm2 = vcmask 7168   ;;  %v392_v38 = vlaneseq  ;;  %s651_s23 = sshll.u32 %s915_s19, 8 }
  0x1f   : > { %v737_v3 = vld [vmem:[%s951_s7 + $0x38] sm:$0xff]   ;;  %663 = vmatprep.subr.bf16.mxu0 %v736_v2  ;;  %v739_v5 = vld [vmem:[%s951_s7 + $0x30] sm:$0xff]   ;;  %v741_v7 = vld [vmem:[%s951_s7 + $0x28] sm:$0xff]   ;;  %735 = vset.pattern.permute.xlu0 %v862_v21  ;;  %v396_v41 = vstv %s651_s23  ;;  %p652_p12 = scmp.ne.s32.totalorder %s915_s19, 1 }
  0x20   : > { %664 = vmatpush3.bf16.xpose.msra.mxu0 %v737_v3  ;;  %v742_v8 = vld [vmem:[%s951_s7 + $0x60] sm:$0xff]   ;;  %v213_v10 = vld [vmem:[%s1073_s0 + $0x8] sm:$0xff]  ;;  %v744_v13 = vld [vmem:[%s951_s7 + $0x58] sm:$0xff]   ;;  %734 = vset.pattern.permute.xlu1 %v862_v21  ;;  %v393_v39 = vand.u32 127, %v392_v38 }
  0x21   : > { %665 = vmatprep.subr.bf16.mxu0 %v738_v4  ;;  %v212_v9 = vld [vmem:[%s1073_s0] sm:$0xff]  ;;  %v745_v14 = vld [vmem:[%s951_s7 + $0x18] sm:$0xff]   ;;  %v746_v15 = vld [vmem:[%s951_s7 + $0x50] sm:$0xff]  }
  0x22   : > { %v214_v11 = vpack.c.bf16 %v213_v10, %v212_v9  ;;  %v743_v12 = vld [vmem:[%s951_s7 + $0x20] sm:$0xff]   ;;  %v747_v16 = vld [vmem:[%s951_s7 + $0x10] sm:$0xff]   ;;  %v748_v17 = vld [vmem:[%s951_s7 + $0x48] sm:$0xff]   ;;  %v394_v40 = vadd.s32 128, %v393_v39  ;;  %v397_v42 = vadd.s32 %v396_v41, %v393_v39 }
  0x23   : > { %v749_v18 = vld [vmem:[%s951_s7 + $0x8] sm:$0xff]   ;;  %v750_v19 = vld [vmem:[%s951_s7 + $0x40] sm:$0xff]  }
  0x24   : > { %679 = vmatprep.mubr.bf16.mxu0 %v214_v11  ;;  %v751_v20 = vld [vmem:[%s951_s7] sm:$0xff]   ;;  %v427_v32 = vld [vmem:[#allocation2 + $0x8] sm:$0xff]  ;;  %v398_v43 = vadd.s32 %v396_v41, %v394_v40 }
  0x25   : > { %v985_v28 = vld [vmem:[%s1075_s2] sm:$0xff]  ;;  %v993_v37 = vld [vmem:[%s1075_s2 + $0x8] sm:$0xff] }
  0x26   : > { %v426_v29 = vld [vmem:[#allocation2] sm:$0xff]  ;;  %v400_v9 = vld [vmem:[#allocation4 + $0x8] sm:$0xff] }
  0x27   : > { %v399_v4 = vld [vmem:[#allocation4] sm:$0xff] }
  0x28   : > { %666 = vmatpush3.bf16.xpose.msra.mxu0 %v739_v5 }
  0x29   : > { %667 = vmatprep.subr.bf16.mxu0 %v740_v6 }
  0x30   : > { %668 = vmatpush3.bf16.xpose.msra.mxu0 %v741_v7 }
  0x31   : > { %669 = vmatprep.subr.bf16.mxu0 %v742_v8 }
  0x38   : > { %670 = vmatpush3.bf16.xpose.msra.mxu0 %v743_v12 }
  0x39   : > { %671 = vmatprep.subr.bf16.mxu0 %v744_v13  ;;  %v436_v13 = vld [vmem:[#allocation3] sm:$0xff] }
  0x40   : > { %672 = vmatpush3.bf16.xpose.msra.mxu0 %v745_v14 }
  0x41   : > { %673 = vmatprep.subr.bf16.mxu0 %v746_v15 }
  0x48   : > { %674 = vmatpush3.bf16.xpose.msra.mxu0 %v747_v16 }
  0x49   : > { %675 = vmatprep.subr.bf16.mxu0 %v748_v17  ;;  %v437_v17 = vld [vmem:[#allocation3 + $0x8] sm:$0xff] }
  0x50   : > { %676 = vmatpush3.bf16.xpose.msra.mxu0 %v749_v18 }
  0x51   : > { %677 = vmatprep.subr.bf16.mxu0 %v750_v19 }
  0x58   : > { %678 = vmatpush3.bf16.xpose.msra.mxu0 %v751_v20 }
  0x5f   : > { %680 = vmatmul.mubr.bf16.vlgmr.msra.gmra.mxu0 %v214_v11 }
 0x11f   : > { %v377_v22 = vpop.f32.mrf.mxu0 }
 0x120   : > { %386 = vst [vmem:[%s953_s8] sm:$0xff] %v377_v22 }
 0x121   : > { %v379_v23 = vpop.f32.mrf.mxu0 }
 0x122   : > { %387 = vst [vmem:[%s953_s8 + $0x8] sm:$0xff] %v379_v23  ;;  %v428_v24 = vmax.f32 %v377_v22, %v379_v23 }
 0x123   : > { %v381_v25 = vpop.f32.mrf.mxu0 }
 0x124   : > { %388 = vst [vmem:[%s953_s8 + $0x10] sm:$0xff] %v381_v25  ;;  %429 = vmax.xlane.f32.xlu0 %v428_v24 }
 0x125   : > { %v383_v26 = vpop.f32.mrf.mxu0 }
 0x126   : > { %389 = vst [vmem:[%s953_s8 + $0x18] sm:$0xff] %v383_v26  ;;  %v431_v27 = vmax.f32 %v381_v25, %v383_v26 }
 0x128   : > { %432 = vmax.xlane.f32.xlu0 %v431_v27 }
 0x13e   : > { %402 = vperm.xlu0 %735, %v985_v28  }
 0x1ad   : > { %v430_v30 = vpop.xlane.xlu0 %429 }
 0x1ae   : > { %v434_v31 = vmax.f32 %v426_v29, %v430_v30 }
 0x1b0   : > { %v438_v33 = vsub.f32 %v426_v29, %v434_v31  ;;  %478 = vst.msk [vmem:[#allocation2] sm:$0xff] %vm423_vm2, %v434_v31  ;;  %448 = vperm.xlu1 %734, %v434_v31  }
 0x1b1   : > { %v433_v34 = vpop.xlane.xlu0 %432 }
 0x1b2   : > { %v435_v35 = vmax.f32 %v427_v32, %v433_v34  ;;  %v440_v7 = vmul.f32 1.442695, %v438_v33 }
 0x1b4   : > { %v439_v36 = vsub.f32 %v427_v32, %v435_v35  ;;  %479 = vst.msk [vmem:[#allocation2 + $0x8] sm:$0xff] %vm423_vm2, %v435_v35  ;;  %453 = vperm.xlu1 %734, %v435_v35  }
 0x1b6   : > { %v442_v8 = vmul.f32 1.442695, %v439_v36 }
 0x1b8   : > { %405 = vperm.xlu1 %734, %v993_v37  }
 0x1b9   : > { %v403_v44 = vpop.permute.xlu0 %402 }
 0x1ba   : > { %vm407_vm3 = vcmp.eq.s32.totalorder %v397_v42, %v403_v44  ;;  %vm408_vm4 = vcmp.eq.s32.totalorder %v398_v43, %v403_v44 }
 0x1bb   : > { %v411_v45 = vsel %vm407_vm3, %v377_v22, 0.0  ;;  %v412_v46 = vsel %vm408_vm4, %v379_v23, 0.0 }
 0x1bc   : > { %v415_v47 = vadd.f32 %v412_v46, %v411_v45 }
 0x1dc   : > { %416 = vadd.xlane.f32.xlu1 %v415_v47 }
 0x22b   : > { %v449_v48 = vpop.permute.xlu1 %448 }
 0x22c   : > { %v456_v49 = vsub.f32 %v377_v22, %v449_v48  ;;  %v457_v50 = vsub.f32 %v379_v23, %v449_v48 }
 0x22e   : > { %v460_v51 = vmul.f32 1.442695, %v456_v49  ;;  %v462_v52 = vmul.f32 1.442695, %v457_v50 }
 0x22f   : > { %v454_v53 = vpop.permute.xlu1 %453 }
 0x230   : > { %752 = vpow2.f32 %v460_v51  ;;  %v458_v54 = vsub.f32 %v381_v25, %v454_v53  ;;  %v459_v55 = vsub.f32 %v383_v26, %v454_v53 }
 0x231   : > { %754 = vpow2.f32 %v462_v52 }
 0x232   : > { %v464_v56 = vmul.f32 1.442695, %v458_v54  ;;  %v466_v57 = vmul.f32 1.442695, %v459_v55 }
 0x233   : > { %v406_v58 = vpop.permute.xlu1 %405 }
 0x234   : > { %756 = vpow2.f32 %v464_v56  ;;  %vm409_vm5 = vcmp.eq.s32.totalorder %v397_v42, %v406_v58  ;;  %vm410_vm6 = vcmp.eq.s32.totalorder %v398_v43, %v406_v58 }
 0x235   : > { %758 = vpow2.f32 %v466_v57  ;;  %v413_v59 = vsel %vm409_vm5, %v381_v25, 0.0  ;;  %v414_v60 = vsel %vm410_vm6, %v383_v26, 0.0 }
 0x236   : > { %v418_v61 = vadd.f32 %v414_v60, %v413_v59  ;;  %760 = vpow2.f32 %v440_v7 }
 0x237   : > { %762 = vpow2.f32 %v442_v8 }
 0x238   : > { %419 = vadd.xlane.f32.xlu1 %v418_v61 }
 0x23d   : > { %v753_v62 = vpop.eup %752 }
 0x23e   : > { %v755_v63 = vpop.eup %754 }
 0x23f   : > { %v468_v0 = vadd.f32 %v755_v63, %v753_v62 }
 0x241   : > { %v757_v1 = vpop.eup %756  ;;  %469 = vadd.xlane.f32.xlu0 %v468_v0 }
 0x242   : > { %v759_v2 = vpop.eup %758 }
 0x243   : > { %v471_v3 = vadd.f32 %v759_v2, %v757_v1  ;;  %v761_v12 = vpop.eup %760 }
 0x244   : > { %v444_v14 = vmul.f32 %v761_v12, %v436_v13  ;;  %v763_v15 = vpop.eup %762 }
 0x245   : > { %472 = vadd.xlane.f32.xlu1 %v471_v3  ;;  %v445_v19 = vmul.f32 %v763_v15, %v437_v17 }
 0x265   : > { %v417_v5 = vpop.xlane.xlu1 %416 }
 0x266   : > { %v421_v6 = vadd.f32 %v417_v5, %v399_v4 }
 0x268   : > { %424 = vst.msk [vmem:[#allocation4] sm:$0xff] %vm423_vm2, %v421_v6 }
 0x2c1   : > { %v420_v10 = vpop.xlane.xlu1 %419 }
 0x2c2   : > { %v422_v11 = vadd.f32 %v420_v10, %v400_v9 }
 0x2c4   : > { %425 = vst.msk [vmem:[#allocation4 + $0x8] sm:$0xff] %vm423_vm2, %v422_v11 }
 0x2ca   : > { %v470_v16 = vpop.xlane.xlu0 %469 }
 0x2cb   : > { %v474_v18 = vadd.f32 %v470_v16, %v444_v14 }
 0x2cd   : > { %476 = vst.msk [vmem:[#allocation3] sm:$0xff] %vm423_vm2, %v474_v18  ;;  %483 = sbr.rel (%p652_p12) target bundleno = 769 (0x301), region = 40 }
 0x2ce   : > { %v473_v20 = vpop.xlane.xlu1 %472 }
 0x2cf   : > { %v475_v21 = vadd.f32 %v473_v20, %v445_v19 }
 0x2d1   : > { %477 = vst.msk [vmem:[#allocation3 + $0x8] sm:$0xff] %vm423_vm2, %v475_v21 }
 0x2d2   : > { %vm494_vm7 = vcmp.ne.s32.totalorder %v985_v28, 4294967196  ;;  %vm495_vm8 = vcmp.ne.s32.totalorder %v993_v37, 4294967196  ;;  %v863_v24 = vmov 0.0   ;;  %v484_v28 = vld [vmem:[#allocation2] sm:$0xff]  ;;  %v485_v37 = vld [vmem:[#allocation2 + $0x8] sm:$0xff]  ;;  %vm527_vm9 = vcmask 0  }
 0x2d3   : > { %v653_v25 = vsel %vm494_vm7, 1.0, %v863_v24  ;;  %v654_v26 = vsel %vm495_vm8, 1.0, %v863_v24  ;;  %v500_v42 = vld [vmem:[#allocation4] sm:$0xff]  ;;  %v501_v44 = vld [vmem:[#allocation4 + $0x8] sm:$0xff] }
 0x2d4   : > { %v486_v22 = vld [vmem:[#allocation3] sm:$0xff]  ;;  %v515_v27 = vsel %vm423_vm2, %v653_v25, 0.0  ;;  %v516_v29 = vsel %vm423_vm2, %v654_v26, 0.0 }
 0x2d5   : > { %764 = vlog2.f32 %v486_v22  ;;  %v517_v30 = vadd.f32 %v516_v29, %v515_v27 }
 0x2d7   : > { %v518_v31 = vrot.slane %v517_v30, 4 }
 0x2d8   : > { %v487_v23 = vld [vmem:[#allocation3 + $0x8] sm:$0xff] }
 0x2d9   : > { %766 = vlog2.f32 %v487_v23  ;;  %v519_v32 = vadd.f32 %v518_v31, %v517_v30 }
 0x2db   : > { %v520_v33 = vrot.slane %v519_v32, 2 }
 0x2dd   : > { %v521_v34 = vadd.f32 %v520_v33, %v519_v32 }
 0x2df   : > { %v522_v35 = vrot.slane %v521_v34, 1 }
 0x2e1   : > { %v523_v40 = vadd.f32 %v522_v35, %v521_v34 }
 0x2e2   : > { %v765_v36 = vpop.eup %764 }
 0x2e3   : > { %v489_v39 = vmul.f32 0.6931472, %v765_v36  ;;  %v524_v47 = vmax.f32 %v523_v40, 1.0 }
 0x2e5   : > { %v492_v43 = vadd.f32 %v489_v39, %v484_v28  ;;  %768 = vrcp.f32 %v524_v47 }
 0x2e6   : > { %v767_v38 = vpop.eup %766 }
 0x2e7   : > { %v491_v41 = vmul.f32 0.6931472, %v767_v38  ;;  %v502_v46 = vsub.f32 %v492_v43, %v500_v42 }
 0x2e9   : > { %v493_v45 = vadd.f32 %v491_v41, %v485_v37  ;;  %v504_v49 = vmul.f32 %v653_v25, %v502_v46 }
 0x2eb   : > { %v503_v48 = vsub.f32 %v493_v45, %v501_v44  ;;  %v506_v51 = vsel %vm423_vm2, %v504_v49, 0.0 }
 0x2ed   : > { %v505_v50 = vmul.f32 %v654_v26, %v503_v48 }
 0x2ef   : > { %v507_v52 = vsel %vm423_vm2, %v505_v50, 0.0 }
 0x2f0   : > { %v508_v53 = vadd.f32 %v507_v52, %v506_v51 }
 0x2f2   : > { %v509_v54 = vrot.slane %v508_v53, 4  ;;  %v769_v59 = vpop.eup %768 }
 0x2f4   : > { %v510_v55 = vadd.f32 %v509_v54, %v508_v53 }
 0x2f6   : > { %v511_v56 = vrot.slane %v510_v55, 2 }
 0x2f8   : > { %v512_v57 = vadd.f32 %v511_v56, %v510_v55 }
 0x2fa   : > { %v513_v58 = vrot.slane %v512_v57, 1 }
 0x2fc   : > { %v514_v60 = vadd.f32 %v513_v58, %v512_v57 }
 0x2fe   : > { %v526_v61 = vmul.f32 %v769_v59, %v514_v60 }
 0x300   : > { %528 = vst.msk [vmem:[#allocation7] sm:$0x1] %vm527_vm9, %v526_v61 }
 0x301 PF: > { %s1015_s30 = scalar_lea.hbm %s1076_s3, %s651_s23  ;;  %s543_s5 = sshll.u32 %s953_s8, 4  ;;  %s1018_s5 = int_to_ptr.vmem [resolvable:$true] %s543_s5 }
 0x302   : > { %s1022_s6 = scalar_lea.sflag [#allocation6], %s186_s27  ;;  %s770_s7 = scalar_lea.vmem %s1018_s5, 512 }
 0x303   : > { %p771_p13 = scmp.ne.s32.totalorder %s1018_s5, %s770_s7  ;;  %s864_s9 = smov [#allocation5]  }
 0x304   : > { %s774_s10 = sshll.u32 %s864_s9, 4  ;;  %s775_s10 = int_to_ptr.vmem [resolvable:$false] %s774_s10 }
 0x305   : > { %p772_p0 = pnand %p771_p13, %p934_p5  ;;  %s776_s11 = scalar_lea.vmem %s775_s10, 1024 }
 0x306   : > { %p777_p3 = scmp.lt.s32.totalorder %s1018_s5, %s775_s10  ;;  %p778_p4 = scmp.lt.s32.totalorder %s776_s11, %s770_s7 }
 0x307   : > { %p773_p1 = pneg %p772_p0 }
 0x308   : > { %p779_p7 = por %p778_p4, %p777_p3 }
 0x30a   : > { %p780_p8 = pnand %p779_p7, %p773_p1 }
 0x30c   : > { %783 = shalt.err (!%p780_p8)
}
 0x30d   : > { %s784_s27 = scalar_lea.hbm %s1015_s30, 512  ;;  %s788_s13 = scalar_lea.hbm %s1076_s3, 1024 }
 0x30e   : > { %p785_p9 = scmp.ne.s32.totalorder %s1015_s30, %s784_s27  ;;  %p789_p12 = scmp.lt.s32.totalorder %s1015_s30, %s1076_s3 }
 0x30f   : > { %p790_p13 = scmp.lt.s32.totalorder %s788_s13, %s784_s27 }
 0x310   : > { %p786_p10 = pnand %p785_p9, %p934_p5 }
 0x311   : > { %p791_p0 = por %p790_p13, %p789_p12 }
 0x312   : > { %p787_p11 = pneg %p786_p10 }
 0x314   : > { %p792_p1 = pnand %p791_p0, %p787_p11 }
 0x316   : > { %795 = shalt.err (!%p792_p1)
}
 0x317   : > { %s865_s22 = smov 256   ;;  %s866_s23 = smov 512  }
 0x318   : > { %s867_s28 = smov 16   ;;  %s868_s29 = smov [#allocation7]  }
 0x319   : > { %681 = dma.vmem_to_hbm [thread:$0]  (%p934_p5), %s1018_s5, 512, %s1015_s30, %s1022_s6, %s865_s22, %s866_s23, %s867_s28  }
 0x31a   : > { %s557_s7 = sshll.u32 %s868_s29, 4  ;;  %s558_s7 = int_to_ptr.vmem [resolvable:$true] %s557_s7 }
 0x31b   : > { %s796_s9 = scalar_lea.vmem %s558_s7, 16  ;;  %s802_s10 = scalar_lea.vmem %s558_s7, 32 }
 0x31c   : > { %p797_p3 = scmp.ne.s32.totalorder %s558_s7, %s796_s9  ;;  %p803_p8 = scmp.lt.s32.totalorder %s558_s7, %s558_s7 }
 0x31d   : > { %p804_p9 = scmp.lt.s32.totalorder %s802_s10, %s796_s9 }
 0x31e   : > { %p798_p4 = pnand %p797_p3, %p105_p2 }
 0x31f   : > { %p805_p10 = por %p804_p9, %p803_p8 }
 0x320   : > { %p799_p7 = pneg %p798_p4 }
 0x322   : > { %p806_p11 = pnand %p805_p10, %p799_p7 }
 0x324   : > { %809 = shalt.err (!%p806_p11)
}
 0x325   : > { %683 = dma.vmem_to_hbm [thread:$0]  (%p105_p2), %s558_s7, 16, %s1077_s4, [#allocation8]  }
 0x326   : > { %837 = dma.done.wait (%p105_p2), [#allocation8], 16  }
 0x327   : > { %839 = vsyncadd (%p105_p2), [#allocation8], 4294967280 }
 0x328 PF: > { %p693_p5 = scmp.ge.s32.totalorder %s858_s18, 2  ;;  %s573_s25 = sand.u32 1, %s846_s15  }
 0x329   : > { %s574_s30 = scalar_lea.sflag [#allocation6], %s573_s25 }
 0x32a   : > { %p688_p12 = pnand %p693_p5, %p938_p6 }
 0x32c   : > { %p689_p13 = pneg %p688_p12 }
 0x32e   : > { %841 = dma.done.wait (%p689_p13), %s574_s30, 512  }
 0x32f   : > { %843 = vsyncadd (%p689_p13), %s574_s30, 4294966784  ;;  %p16_p0 = scmp.ge.s32.totalorder %s919_s21, 4   ;;  %s1080_s15 = smov %s850_s16 }
 0x330   : > { %s1081_s16 = smov %s854_s17  ;;  %s1082_s17 = smov %s930_s24 }
 0x331   : > { %s1083_s18 = smov %s919_s21  ;;  %18 = sbr.rel (!%p16_p0) target bundleno = 4 (0x4), region = 83 }
 0x336   :  { %579 = vsyncpa [#allocation6], 1 }
 0x337   :  { %581 = vsyncpa [#allocation6 + $0x1], 1 }
 0x338   :  { %582 = vsyncpa [#allocation8], 1 }

// kernel: gptc_forward.2
= control target key start
LH: loop header
LB: loop body
LE: loop exit
PB: predicated region body
PF: predicated region fallthrough
CT: control target
= control target key end

     0   :  { %s4449_s0 = inlined_call_operand.vmem [shape: f32[16,128], index: 0, kind: input, shape index: {}]   ;;  %s4450_s1 = inlined_call_operand.vmem [shape: f32[128,16], index: 1, kind: input, shape index: {}]   ;;  %s4451_s2 = inlined_call_operand.vmem [shape: f32[128,128], index: 2, kind: input, shape index: {}]   ;;  %s4452_s3 = inlined_call_operand.vmem [shape: f32[6,1,128], index: 3, kind: input, shape index: {}]   ;;  %s4453_s4 = inlined_call_operand.vmem [shape: f32[6,1,128], index: 4, kind: input, shape index: {}]   ;;  %s4454_s5 = inlined_call_operand.hbm [shape: bf16[6,128,384], index: 5, kind: input, shape index: {}]   ;;  %s4455_s6 = inlined_call_operand.vmem [shape: f32[6,1,384], index: 6, kind: input, shape index: {}]   ;;  %s4456_s7 = inlined_call_operand.hbm [shape: bf16[6,128,128], index: 7, kind: input, shape index: {}]   ;;  %s4457_s8 = inlined_call_operand.vmem [shape: f32[6,1,128], index: 8, kind: input, shape index: {}]   ;;  %s4458_s9 = inlined_call_operand.vmem [shape: f32[6,1,128], index: 9, kind: input, shape index: {}]   ;;  %s4459_s10 = inlined_call_operand.vmem [shape: f32[6,1,128], index: 10, kind: input, shape index: {}]   ;;  %s4460_s11 = inlined_call_operand.hbm [shape: bf16[6,128,512], index: 11, kind: input, shape index: {}]   ;;  %s4461_s12 = inlined_call_operand.vmem [shape: f32[6,1,512], index: 12, kind: input, shape index: {}]   ;;  %s4462_s13 = inlined_call_operand.hbm [shape: bf16[6,512,128], index: 13, kind: input, shape index: {}]   ;;  %s4463_s14 = inlined_call_operand.vmem [shape: f32[6,1,128], index: 14, kind: input, shape index: {}]   ;;  %s4464_s15 = inlined_call_operand.vmem [shape: f32[1,128], index: 15, kind: input, shape index: {}]   ;;  %s4465_s16 = inlined_call_operand.vmem [shape: f32[1,128], index: 16, kind: input, shape index: {}]   ;;  %s4466_s17 = inlined_call_operand.vmem [shape: f32[16,128], index: 17, kind: output, shape index: {}]  }
   0x1   :  { %4479 = sst [smem:[#allocation15_spill]] %s4449_s0 }
   0x2   :  { %4480 = sst [smem:[#allocation16_spill]] %s4450_s1 }
   0x3   :  { %4481 = sst [smem:[#allocation17_spill]] %s4451_s2 }
   0x4   :  { %4482 = sst [smem:[#allocation18_spill]] %s4454_s5 }
   0x5   :  { %4483 = sst [smem:[#allocation19_spill]] %s4456_s7 }
   0x6   :  { %4484 = sst [smem:[#allocation20_spill]] %s4460_s11 }
   0x7   :  { %4485 = sst [smem:[#allocation21_spill]] %s4462_s13 }
   0x8   :  { %4486 = sst [smem:[#allocation22_spill]] %s4463_s14 }
   0x9   :  { %4487 = sst [smem:[#allocation23_spill]] %s4464_s15 }
   0xa   :  { %4488 = sst [smem:[#allocation24_spill]] %s4465_s16 }
   0xb   :  { %4489 = sst [smem:[#allocation25_spill]] %s4466_s17 }
   0xc   :  { %22 = vsyncpa [#allocation3], 0 }
   0xd   :  { %24 = vsyncpa [#allocation3 + $0x1], 0 }
   0xe   :  { %25 = vsyncpa [#allocation5], 0 }
   0xf   :  { %27 = vsyncpa [#allocation5 + $0x1], 0 }
  0x10   :  { %28 = vsyncpa [#allocation8], 0 }
  0x11   :  { %30 = vsyncpa [#allocation8 + $0x1], 0  ;;  %s3571_s24 = smov 0   ;;  %s3573_s25 = smov 0  }
  0x12   :  { %s3575_s26 = smov 0   ;;  %s3577_s27 = smov 0  }
  0x13 LB: > { %4490 = sst [smem:[#allocation12_spill]] %s3462_s26  ;;  %s3590_s28 = sadd.s32 4294967295, %s3466_s27   ;;  %s3466_s27 = sphi %s3577_s27, %s4519_s27   ;;  %s3462_s26 = sphi %s3575_s26, %s4521_s26   ;;  %s3458_s25 = sphi %s3573_s25, %s4523_s25   ;;  %s3454_s24 = sphi %s3571_s24, %s4522_s24  }
  0x14   : > { %s3593_s29 = sadd.s32 1, %s3466_s27   ;;  %s158_s30 = sadd.s32 1, %s3462_s26 }
  0x15   : > { %4491 = sst [smem:[#allocation13_spill]] %s3593_s29  ;;  %s155_s0 = ssub.s32 %s3466_s27, %s3593_s29 }
  0x16   : > { %p156_p0 = scmp.eq.s32.totalorder %s155_s0, 0  ;;  %p165_p1 = scmp.ne.s32.totalorder %s3462_s26, %s3458_s25 }
  0x17   : > { %p166_p2 = scmp.eq.s32.totalorder %s3466_s27, 0  ;;  %p171_p3 = scmp.ne.s32.totalorder %s3458_s25, %s3454_s24 }
  0x18   : > { %s3603_s18 = scalar_select %p156_p0, %s3462_s26, %s158_s30  }
  0x19   : > { %p167_p4 = por %p166_p2, %p165_p1  ;;  %p172_p5 = scmp.eq.s32.totalorder %s3590_s28, 0 }
  0x1a   : > { %4492 = sst [smem:[#allocation14_spill]] %s3603_s18  ;;  %p3056_p6 = scmp.lt.s32.totalorder %s3466_s27, 6 }
  0x1b   : > { %p3607_p7 = por %p172_p5, %p171_p3  ;;  %s3612_s1 = sand.u32 1, %s3462_s26  }
  0x1c   : > { %p3614_p8 = pnand %p3056_p6, %p167_p4  ;;  %s547_s21 = sand.u32 1, %s3466_s27  }
  0x1d   : > { %s4493_s19 = scalar_select %p3607_p7, 1, 0 }
  0x1e   : > { %s2742_s22 = sshll.u32 %s3612_s1, 6  ;;  %s2872_s23 = sshll.u32 %s3466_s27, 10 }
  0x1f   : > { %s551_s24 = scalar_lea.vmem [#allocation4], %s2742_s22  ;;  %s4495_s7 = sld [smem:[#allocation19_spill]] }
  0x20   : > { %s558_s0 = sshll.u32 %s551_s24, 4  ;;  %s3628_s26 = scalar_lea.sflag [#allocation5], %s547_s21  ;;  %s3626_s0 = int_to_ptr.vmem [resolvable:$true] %s558_s0 }
  0x21   : > { %p3634_p10 = pneg %p3614_p8 }
  0x25   : > { %s3624_s29 = scalar_lea.hbm %s4495_s7, %s2872_s23  ;;  %s3317_s23 = scalar_lea.hbm %s4495_s7, 6144 }
  0x26   : > { %s3312_s16 = scalar_lea.hbm %s3624_s29, 1024  ;;  %p3318_p13 = scmp.lt.s32.totalorder %s3624_s29, %s4495_s7 }
  0x27   : > { %p3313_p9 = scmp.ne.s32.totalorder %s3624_s29, %s3312_s16  ;;  %p3319_p0 = scmp.lt.s32.totalorder %s3317_s23, %s3312_s16 }
  0x29   : > { %p3315_p11 = pnand %p3634_p10, %p3313_p9  ;;  %p3320_p1 = por %p3319_p0, %p3318_p13 }
  0x2b   : > { %p3316_p12 = pneg %p3315_p11 }
  0x2d   : > { %p3321_p2 = pnand %p3320_p1, %p3316_p12 }
  0x2f   : > { %3324 = shalt.err (!%p3321_p2)
}
  0x30   : > { %s3325_s21 = scalar_lea.vmem %s3626_s0, 1024  ;;  %s3468_s2 = smov [#allocation4]  }
  0x31   : > { %p3326_p3 = scmp.ne.s32.totalorder %s3626_s0, %s3325_s21  ;;  %s3330_s18 = sshll.u32 %s3468_s2, 4  ;;  %s3331_s18 = int_to_ptr.vmem [resolvable:$false] %s3330_s18 }
  0x32   : > { %s3332_s22 = scalar_lea.vmem %s3331_s18, 2048  ;;  %p3333_p6 = scmp.lt.s32.totalorder %s3626_s0, %s3331_s18 }
  0x33   : > { %p3328_p4 = pnand %p3326_p3, %p3634_p10  ;;  %p3334_p9 = scmp.lt.s32.totalorder %s3332_s22, %s3325_s21 }
  0x35   : > { %p3329_p5 = pneg %p3328_p4  ;;  %p3335_p11 = por %p3334_p9, %p3333_p6 }
  0x37   : > { %p3336_p7 = pnand %p3335_p11, %p3329_p5 }
  0x39   : > { %3339 = shalt.err (!%p3336_p7)
}
  0x3a   : > { %s4477_s16 = smov 64   ;;  %s4478_s23 = smov 4  }
  0x3b   : > { %3049 = dma.hbm_to_vmem [thread:$0]  (!%p3614_p8), %s3624_s29, 1024, %s3626_s0, %s3628_s26, %s4477_s16, %s4477_s16, %s4478_s23  }
  0x3c   : > { %p2751_p12 = scmp.ge.s32.totalorder %s3466_s27, 1  ;;  %p639_p13 = scmp.lt.s32.totalorder %s3466_s27, 7 }
  0x3d   : > { %s3031_s2 = smul.u32 192, %s3612_s1  ;;  %s4498_s5 = sld [smem:[#allocation18_spill]] }
  0x3e   : > { %p3663_p7 = pnand %p2751_p12, %p639_p13  ;;  %s3032_s30 = smul.u32 3072, %s3466_s27 }
  0x3f   : > { %s523_s7 = scalar_lea.vmem [#allocation2], %s3031_s2  ;;  %s520_s29 = scalar_lea.sflag [#allocation3], %s3612_s1 }
  0x40   : > { %s4497_s24 = scalar_select %p3663_p7, 1, 0 }
  0x41   : > { %s530_s17 = sshll.u32 %s523_s7, 4  ;;  %s3673_s17 = int_to_ptr.vmem [resolvable:$true] %s530_s17 }
  0x43   : > { %s3671_s22 = scalar_lea.hbm %s4498_s5, %s3032_s30  ;;  %s3345_s14 = scalar_lea.hbm %s4498_s5, 18432 }
  0x44   : > { %s3340_s0 = scalar_lea.hbm %s3671_s22, 3072  ;;  %p3346_p3 = scmp.lt.s32.totalorder %s3671_s22, %s4498_s5 }
  0x45   : > { %p3341_p0 = scmp.ne.s32.totalorder %s3671_s22, %s3340_s0  ;;  %p3347_p4 = scmp.lt.s32.totalorder %s3345_s14, %s3340_s0 }
  0x47   : > { %p3343_p1 = pnand %p3341_p0, %p3634_p10  ;;  %p3348_p5 = por %p3347_p4, %p3346_p3 }
  0x49   : > { %p3344_p2 = pneg %p3343_p1 }
  0x4b   : > { %p3349_p6 = pnand %p3348_p5, %p3344_p2 }
  0x4d   : > { %3352 = shalt.err (!%p3349_p6)
}
  0x4e   : > { %s3353_s7 = scalar_lea.vmem %s3673_s17, 3072  ;;  %s3471_s2 = smov [#allocation2]  }
  0x4f   : > { %p3354_p9 = scmp.ne.s32.totalorder %s3673_s17, %s3353_s7  ;;  %s3358_s16 = sshll.u32 %s3471_s2, 4  ;;  %s3359_s16 = int_to_ptr.vmem [resolvable:$false] %s3358_s16 }
  0x50   : > { %s3360_s23 = scalar_lea.vmem %s3359_s16, 6144  ;;  %p3361_p13 = scmp.lt.s32.totalorder %s3673_s17, %s3359_s16 }
  0x51   : > { %p3356_p11 = pnand %p3354_p9, %p3634_p10  ;;  %p3362_p0 = scmp.lt.s32.totalorder %s3360_s23, %s3353_s7 }
  0x53   : > { %p3357_p12 = pneg %p3356_p11  ;;  %p3363_p1 = por %p3362_p0, %p3361_p13 }
  0x55   : > { %p3364_p7 = pnand %p3363_p1, %p3357_p12 }
  0x57   : > { %3367 = shalt.err (!%p3364_p7)
}
  0x58   : > { %s3472_s14 = smov 192   ;;  %s3473_s18 = smov 12  }
  0x59   : > { %3046 = dma.hbm_to_vmem [thread:$0]  (!%p3614_p8), %s3671_s22, 3072, %s3673_s17, %s520_s29, %s3472_s14, %s3472_s14, %s3473_s18  }
  0x5a   : > { %s2745_s0 = sshll.u32 %s3612_s1, 8  ;;  %s2873_s21 = sshll.u32 %s3466_s27, 12 }
  0x5b   : > { %s4499_s11 = sld [smem:[#allocation20_spill]]  ;;  %s590_s16 = scalar_lea.vmem [#allocation6], %s2745_s0 }
  0x5c   : > { %s597_s23 = sshll.u32 %s590_s16, 4  ;;  %s3709_s23 = int_to_ptr.vmem [resolvable:$true] %s597_s23 }
  0x61   : > { %s3705_s2 = scalar_lea.hbm %s4499_s11, %s2873_s21  ;;  %s3373_s29 = scalar_lea.hbm %s4499_s11, 24576 }
  0x62   : > { %s3368_s5 = scalar_lea.hbm %s3705_s2, 4096  ;;  %p3374_p4 = scmp.lt.s32.totalorder %s3705_s2, %s4499_s11 }
  0x63   : > { %p3369_p7 = scmp.ne.s32.totalorder %s3705_s2, %s3368_s5  ;;  %p3375_p5 = scmp.lt.s32.totalorder %s3373_s29, %s3368_s5 }
  0x65   : > { %p3371_p2 = pnand %p3369_p7, %p3634_p10  ;;  %p3376_p6 = por %p3375_p5, %p3374_p4 }
  0x67   : > { %p3372_p3 = pneg %p3371_p2 }
  0x69   : > { %p3377_p9 = pnand %p3376_p6, %p3372_p3 }
  0x6b   : > { %3380 = shalt.err (!%p3377_p9)
}
  0x6c   : > { %s3381_s30 = scalar_lea.vmem %s3709_s23, 4096  ;;  %s3474_s7 = smov [#allocation6]  }
  0x6d   : > { %p3382_p11 = scmp.ne.s32.totalorder %s3709_s23, %s3381_s30  ;;  %s3386_s16 = sshll.u32 %s3474_s7, 4  ;;  %s3387_s16 = int_to_ptr.vmem [resolvable:$false] %s3386_s16 }
  0x6e   : > { %s3388_s17 = scalar_lea.vmem %s3387_s16, 8192  ;;  %p3389_p0 = scmp.lt.s32.totalorder %s3709_s23, %s3387_s16 }
  0x6f   : > { %p3384_p12 = pnand %p3382_p11, %p3634_p10  ;;  %p3390_p1 = scmp.lt.s32.totalorder %s3388_s17, %s3381_s30 }
  0x71   : > { %p3385_p13 = pneg %p3384_p12  ;;  %p3391_p7 = por %p3390_p1, %p3389_p0 }
  0x73   : > { %p3392_p2 = pnand %p3391_p7, %p3385_p13 }
  0x75   : > { %3395 = shalt.err (!%p3392_p2)
}
  0x76   : > { %s3475_s5 = smov 256   ;;  %s3476_s22 = smov 16  }
  0x77   : > { %3052 = dma.hbm_to_vmem [thread:$0]  (!%p3614_p8), %s3705_s2, 4096, %s3709_s23, %s3628_s26, %s3475_s5, %s3475_s5, %s3476_s22  }
  0x78   : > { %s4500_s13 = sld [smem:[#allocation21_spill]]  ;;  %s618_s30 = scalar_lea.vmem [#allocation7], %s2745_s0 }
  0x79   : > { %s625_s7 = sshll.u32 %s618_s30, 4  ;;  %s615_s16 = scalar_lea.sflag [#allocation8], %s3612_s1  ;;  %s3741_s7 = int_to_ptr.vmem [resolvable:$true] %s625_s7 }
  0x7e   : > { %s3737_s18 = scalar_lea.hbm %s4500_s13, %s2873_s21  ;;  %s3401_s2 = scalar_lea.hbm %s4500_s13, 24576 }
  0x7f   : > { %s3396_s17 = scalar_lea.hbm %s3737_s18, 4096  ;;  %p3402_p6 = scmp.lt.s32.totalorder %s3737_s18, %s4500_s13 }
  0x80   : > { %p3397_p3 = scmp.ne.s32.totalorder %s3737_s18, %s3396_s17  ;;  %p3403_p9 = scmp.lt.s32.totalorder %s3401_s2, %s3396_s17 }
  0x82   : > { %p3399_p4 = pnand %p3397_p3, %p3634_p10  ;;  %p3404_p11 = por %p3403_p9, %p3402_p6 }
  0x84   : > { %p3400_p5 = pneg %p3399_p4 }
  0x86   : > { %p3405_p12 = pnand %p3404_p11, %p3400_p5 }
  0x88   : > { %3408 = shalt.err (!%p3405_p12)
}
  0x89   : > { %s3409_s1 = scalar_lea.vmem %s3741_s7, 4096  ;;  %s3477_s0 = smov [#allocation7]  }
  0x8a   : > { %p3410_p13 = scmp.ne.s32.totalorder %s3741_s7, %s3409_s1  ;;  %s3414_s5 = sshll.u32 %s3477_s0, 4  ;;  %s3415_s5 = int_to_ptr.vmem [resolvable:$false] %s3414_s5 }
  0x8b   : > { %s3416_s22 = scalar_lea.vmem %s3415_s5, 8192  ;;  %p3417_p7 = scmp.lt.s32.totalorder %s3741_s7, %s3415_s5 }
  0x8c   : > { %p3412_p0 = pnand %p3410_p13, %p3634_p10  ;;  %p3418_p2 = scmp.lt.s32.totalorder %s3416_s22, %s3409_s1 }
  0x8e   : > { %p3413_p1 = pneg %p3412_p0  ;;  %p3419_p3 = por %p3418_p2, %p3417_p7 }
  0x90   : > { %p3420_p4 = pnand %p3419_p3, %p3413_p1 }
  0x92   : > { %3423 = shalt.err (!%p3420_p4)
}
  0x93   : > { %s4501_s29 = smov 4   ;;  %s4502_s14 = smov 64  }
  0x94   : > { %3055 = dma.hbm_to_vmem [thread:$0]  (!%p3614_p8), %s3737_s18, 4096, %s3741_s7, %s615_s16, %s4502_s14, %s4502_s14, %s4501_s29  }
  0x95   : > { %p4503_p10 = scmp.ne.s32.totalorder %s4497_s24, 0 }
  0x96   : > { %s645_s15 = sand.u32 (!%p4503_p10), 1, %s3458_s25   ;;  %p4504_p5 = scmp.ne.s32.totalorder (!%p4503_p10), %s4493_s19, 0 }
  0x97   : > { %643 = sbr.rel (%p4503_p10) target bundleno = 2726 (0xaa6), region = 88  ;;  %s646_s17 = scalar_lea.sflag (!%p4503_p10), [#allocation3], %s645_s15 }
  0x98   : > { %s3033_s30 = smul.u32 (!%p4503_p10), 192, %s645_s15 }
  0x9a   : > { %s3770_s26 = scalar_lea.vmem (!%p4503_p10), [#allocation2], %s3033_s30 }
  0x9c   : > { %3441 = dma.done.wait (%p4504_p5), %s646_s17, 3072  }
  0x9d   : > { %3443 = vsyncadd (%p4504_p5), %s646_s17, 4294964224  ;;  %s654_s20 = sand.u32 1, %s3590_s28   ;;  %s2752_s27 = sshll.u32 %s645_s15, 6 }
  0x9e   : > { %s655_s18 = scalar_lea.sflag [#allocation5], %s654_s20  ;;  %s3777_s7 = scalar_lea.vmem [#allocation4], %s2752_s27 }
  0x9f   : > { %3445 = dma.done.wait (%p4504_p5), %s655_s18, 5120  }
  0xa0   : > { %3447 = vsyncadd (%p4504_p5), %s655_s18, 4294962176  ;;  %s2753_s24 = sshll.u32 %s645_s15, 8  ;;  %s673_s2 = scalar_lea.sflag [#allocation8], %s645_s15 }
  0xa1   : > { %s3783_s16 = scalar_lea.vmem [#allocation6], %s2753_s24  ;;  %s3785_s21 = scalar_lea.vmem [#allocation7], %s2753_s24 }
  0xa2   : > { %3449 = dma.done.wait (%p4504_p5), %s673_s2, 4096  }
  0xa3   : > { %3451 = vsyncadd (%p4504_p5), %s673_s2, 4294963200  ;;  %p763_p8 = scmp.lt.s32.totalorder %s3590_s28, 5  ;;  %s4505_s17 = sld [smem:[#allocation22_spill]] }
  0xa4   : > { %p2756_p6 = scmp.ne.s32.totalorder %s3590_s28, 0 }
  0xa5   : > { %s3793_s23 = scalar_select %p763_p8, %s3590_s28, 5 }
  0xa6   : > { %793 = sbr.rel (%p2756_p6) target bundleno = 175 (0xaf), region = 108  ;;  %s4506_s2 = sld [smem:[#allocation15_spill]] (!%p2756_p6) }
  0xa7   : > { %s3034_s14 = smul.u32 3, %s3793_s23  ;;  %s778_s18 = scalar_lea.vmem %s4458_s9, %s3793_s23 }
  0xa8   : > { %s2755_s22 = sshll.u32 %s3793_s23, 2  ;;  %s4507_s29 = sld [smem:[#allocation25_spill]] (!%p2756_p6) }
  0xa9   : > { %s3819_s5 = scalar_lea.vmem %s4455_s6, %s3034_s14  ;;  %s3825_s13 = scalar_lea.vmem %s4461_s12, %s2755_s22 }
  0xaa   : > { %s788_s20 = scalar_lea.vmem %s4505_s17, %s3793_s23 }
  0xac   : > { %v794_v0 = vld [vmem:[%s4506_s2] sm:$0xff]  ;;  %v795_v1 = vld [vmem:[%s4506_s2 + $0x8] sm:$0xff] }
  0xae   : > { %796 = vst [vmem:[%s4507_s29] sm:$0xff] %v794_v0  ;;  %797 = vst [vmem:[%s4507_s29 + $0x8] sm:$0xff] %v795_v1 }
  0xaf PF: > { %s4508_s30 = sld [smem:[#allocation25_spill]]  ;;  %v3098_v4 = vld [vmem:[%s3770_s26 + $0xac] ss:$12 sps:$4 sm:$0xff]   ;;  %v3100_v5 = vld [vmem:[%s3770_s26 + $0xa8] ss:$12 sps:$4 sm:$0xff]   ;;  %v3478_v6 = vmov 0.0   ;;  %s4509_s11 = scalar_lea.vmem %s4452_s3, %s3793_s23  ;;  %v876_v55 = vlaneseq }
  0xb0   : > { %2955 = vmatprep.subr.bf16.mxu1 %v3478_v6  ;;  %v3101_v7 = vld [vmem:[%s3770_s26 + $0xb0] ss:$12 sps:$4 sm:$0xff]   ;;  %1019 = vmatprep.subr.bf16.mxu0 %v3098_v4  ;;  %v3102_v16 = vld [vmem:[%s3770_s26 + $0x94] ss:$12 sps:$4 sm:$0xff]   ;;  %v3105_v18 = vld [vmem:[%s3770_s26 + $0x98] ss:$12 sps:$4 sm:$0xff]   ;;  %s4510_s29 = scalar_lea.vmem %s4453_s4, %s3793_s23  ;;  %s4514_s24 = scalar_lea.vmem %s4459_s10, %s3793_s23 }
  0xb1   : > { %1020 = vmatpush1.bf16.msra.mxu0 %v3100_v5  ;;  %2956 = vmatpush3.bf16.msra.mxu1 %v3101_v7  ;;  %v3104_v17 = vld [vmem:[%s3770_s26 + $0x90] ss:$12 sps:$4 sm:$0xff]   ;;  %v3108_v20 = vld [vmem:[%s3770_s26 + $0x78] ss:$12 sps:$4 sm:$0xff]   ;;  %v3109_v21 = vld [vmem:[%s3770_s26 + $0x80] ss:$12 sps:$4 sm:$0xff]  }
  0xb2   : > { %2957 = vmatprep.subr.bf16.mxu1 %v3478_v6  ;;  %1021 = vmatprep.subr.bf16.mxu0 %v3102_v16  ;;  %v3106_v19 = vld [vmem:[%s3770_s26 + $0x7c] ss:$12 sps:$4 sm:$0xff]   ;;  %v3110_v22 = vld [vmem:[%s3770_s26 + $0x64] ss:$12 sps:$4 sm:$0xff]   ;;  %v3112_v23 = vld [vmem:[%s3770_s26 + $0x60] ss:$12 sps:$4 sm:$0xff]  }
  0xb3   : > { %v3113_v24 = vld [vmem:[%s3770_s26 + $0x68] ss:$12 sps:$4 sm:$0xff]   ;;  %v3114_v25 = vld [vmem:[%s3770_s26 + $0x4c] ss:$12 sps:$4 sm:$0xff]   ;;  %v3117_v27 = vld [vmem:[%s3770_s26 + $0x50] ss:$12 sps:$4 sm:$0xff]  }
  0xb4   : > { %v3116_v26 = vld [vmem:[%s3770_s26 + $0x48] ss:$12 sps:$4 sm:$0xff]   ;;  %v3479_v29 = vmov 0   ;;  %vm3480_vm0 = vmmov 0   ;;  %v3120_v30 = vld [vmem:[%s3770_s26 + $0x30] ss:$12 sps:$4 sm:$0xff]  }
  0xb5   : > { %v798_v2 = vld [vmem:[%s4508_s30] sm:$0xff]  ;;  %v799_v3 = vld [vmem:[%s4508_s30 + $0x8] sm:$0xff]  ;;  %1022 = vmatpush1.bf16.msra.mxu0 %v3104_v17  ;;  %2958 = vmatpush3.bf16.msra.mxu1 %v3105_v18  ;;  %v3905_v56 = vshrl.u32 %v876_v55, 7  ;;  %s4511_s19 = sld [smem:[#allocation17_spill]]  ;;  %vm1289_vm1 = vcmask 130048   ;;  %p2867_p9 = scmp.ne.s32.totalorder %s3590_s28, 5 }
  0xb6   : > { %802 = vadd.xlane.f32.xlu0 %v798_v2  ;;  %2959 = vmatprep.subr.bf16.mxu1 %v3478_v6  ;;  %v3118_v28 = vld [vmem:[%s3770_s26 + $0x34] ss:$12 sps:$4 sm:$0xff]   ;;  %v3121_v31 = vld [vmem:[%s3770_s26 + $0x38] ss:$12 sps:$4 sm:$0xff]   ;;  %v3122_v32 = vld [vmem:[%s3770_s26 + $0x1c] ss:$12 sps:$4 sm:$0xff]  }
  0xb7   : > { %1023 = vmatprep.subr.bf16.mxu0 %v3106_v19  ;;  %1051 = vmatprep.mubr.bf16.mxu0 %v3479_v29  ;;  %v3124_v33 = vld [vmem:[%s3770_s26 + $0x18] ss:$12 sps:$4 sm:$0xff]   ;;  %v3125_v34 = vld [vmem:[%s3770_s26 + $0x20] ss:$12 sps:$4 sm:$0xff]   ;;  %v3129_v37 = vld [vmem:[%s3770_s26 + $0x8] ss:$12 sps:$4 sm:$0xff]  }
  0xb8   : > { %2971 = vmatprep.mubr.msk.bf16.mxu1 %vm3480_vm0, %v3478_v6  ;;  %v3126_v35 = vld [vmem:[%s3770_s26 + $0x4] ss:$12 sps:$4 sm:$0xff]   ;;  %v3128_v36 = vld [vmem:[%s3770_s26] ss:$12 sps:$4 sm:$0xff]   ;;  %v878_v57 = vsub.s32 0, %v3905_v56  ;;  %v886_v59 = vsub.s32 2, %v3905_v56 }
  0xb9   : > { %1024 = vmatpush1.bf16.msra.mxu0 %v3108_v20  ;;  %2960 = vmatpush3.bf16.msra.mxu1 %v3109_v21  ;;  %v2757_v46 = vld [vmem:[%s4509_s11] ss:$0 sm:$0xff]  ;;  %v882_v60 = vsub.s32 1, %v3905_v56  ;;  %s4512_s0 = sld [smem:[#allocation16_spill]]  ;;  %s4513_s11 = scalar_lea.vmem %s4457_s8, %s3793_s23 }
  0xba   : > { %804 = vadd.xlane.f32.xlu0 %v799_v3  ;;  %2961 = vmatprep.subr.bf16.mxu1 %v3478_v6  ;;  %v2758_v50 = vld [vmem:[%s4510_s29] ss:$0 sm:$0xff]  ;;  %s4516_s14 = sld [smem:[#allocation25_spill]] (!%p2867_p9) }
  0xbb   : > { %1025 = vmatprep.subr.bf16.mxu0 %v3110_v22  ;;  %v874_v58 = vld [vmem:[%s3819_s5] sm:$0x7]  ;;  %v3932_v22 = vld [vmem:[%s4511_s19 + $0x18] sm:$0xff]  ;;  %s4517_s22 = sld [smem:[#allocation23_spill]] (!%p2867_p9) }
  0xbc   : > { %v879_v61 = vrot.slane %v874_v58, %v878_v57  ;;  %v887_v0 = vrot.slane %v874_v58, %v886_v59  ;;  %v883_v1 = vrot.slane %v874_v58, %v882_v60  ;;  %s4518_s15 = sld [smem:[#allocation24_spill]] (!%p2867_p9) }
  0xbd   : > { %1026 = vmatpush1.bf16.msra.mxu0 %v3112_v23  ;;  %2962 = vmatpush3.bf16.msra.mxu1 %v3113_v24  ;;  %v3937_v23 = vld [vmem:[%s4511_s19 + $0x28] sm:$0xff]  ;;  %v3942_v24 = vld [vmem:[%s4511_s19 + $0x10] sm:$0xff] }
  0xbe   : > { %1027 = vmatprep.subr.bf16.mxu0 %v3114_v25  ;;  %2963 = vmatprep.subr.bf16.mxu1 %v3478_v6 }
  0xc1   : > { %1028 = vmatpush1.bf16.msra.mxu0 %v3116_v26  ;;  %2964 = vmatpush3.bf16.msra.mxu1 %v3117_v27  ;;  %v3948_v26 = vld [vmem:[%s4511_s19 + $0x20] sm:$0xff] }
  0xc2   : > { %1029 = vmatprep.subr.bf16.mxu0 %v3118_v28  ;;  %2965 = vmatprep.subr.bf16.mxu1 %v3478_v6 }
  0xc5   : > { %1030 = vmatpush1.bf16.msra.mxu0 %v3120_v30  ;;  %2966 = vmatpush3.bf16.msra.mxu1 %v3121_v31 }
  0xc6   : > { %1031 = vmatprep.subr.bf16.mxu0 %v3122_v32  ;;  %2967 = vmatprep.subr.bf16.mxu1 %v3478_v6 }
  0xc9   : > { %1032 = vmatpush1.bf16.msra.mxu0 %v3124_v33  ;;  %2968 = vmatpush3.bf16.msra.mxu1 %v3125_v34  ;;  %v3957_v33 = vld [vmem:[%s4511_s19 + $0x38] sm:$0xff]  ;;  %v3962_v34 = vld [vmem:[%s4511_s19 + $0x48] sm:$0xff] }
  0xca   : > { %1033 = vmatprep.subr.bf16.mxu0 %v3126_v35  ;;  %2969 = vmatprep.subr.bf16.mxu1 %v3478_v6  ;;  %v3967_v35 = vld [vmem:[%s4511_s19 + $0x30] sm:$0xff] }
  0xcd   : > { %1034 = vmatpush1.bf16.msra.mxu0 %v3128_v36  ;;  %2970 = vmatpush3.bf16.msra.mxu1 %v3129_v37  ;;  %v3973_v37 = vld [vmem:[%s4511_s19 + $0x40] sm:$0xff] }
 0x13f   : > { %v803_v8 = vpop.xlane.xlu0 %802 }
 0x140   : > { %v807_v9 = vmul.f32 0.0078125, %v803_v8  ;;  %v3920_v8 = vld [vmem:[%s4511_s19] sm:$0xff] }
 0x142   : > { %v3855_v10 = vsub.f32 %v798_v2, %v807_v9  ;;  %v3925_v9 = vld [vmem:[%s4511_s19 + $0x8] sm:$0xff] }
 0x143   : > { %v805_v11 = vpop.xlane.xlu0 %804 }
 0x144   : > { %v808_v12 = vmul.f32 0.0078125, %v805_v11  ;;  %v811_v13 = vmul.f32 %v3855_v10, %v3855_v10 }
 0x146   : > { %v3859_v14 = vsub.f32 %v799_v3, %v808_v12  ;;  %813 = vadd.xlane.f32.xlu1 %v811_v13 }
 0x148   : > { %v812_v15 = vmul.f32 %v3859_v14, %v3859_v14 }
 0x14a   : > { %815 = vadd.xlane.f32.xlu1 %v812_v15 }
 0x1cf   : > { %v814_v38 = vpop.xlane.xlu1 %813 }
 0x1d0   : > { %v817_v39 = vmul.f32 0.0078125, %v814_v38 }
 0x1d2   : > { %v819_v40 = vadd.f32 1e-05, %v817_v39 }
 0x1d3   : > { %v816_v41 = vpop.xlane.xlu1 %815 }
 0x1d4   : > { %3218 = vrsqrt.f32 %v819_v40  ;;  %v818_v42 = vmul.f32 0.0078125, %v816_v41 }
 0x1d6   : > { %v820_v43 = vadd.f32 1e-05, %v818_v42 }
 0x1d8   : > { %3220 = vrsqrt.f32 %v820_v43  ;;  %v3981_v43 = vld [vmem:[%s4511_s19 + $0x58] sm:$0xff] }
 0x1e1   : > { %v3219_v44 = vpop.eup %3218 }
 0x1e2   : > { %v823_v45 = vmul.f32 %v3219_v44, %v3855_v10  ;;  %v3986_v44 = vld [vmem:[%s4511_s19 + $0x68] sm:$0xff] }
 0x1e4   : > { %v831_v49 = vmul.f32 %v2757_v46, %v823_v45  ;;  %v3991_v45 = vld [vmem:[%s4511_s19 + $0x50] sm:$0xff] }
 0x1e5   : > { %v3221_v47 = vpop.eup %3220 }
 0x1e6   : > { %v824_v48 = vmul.f32 %v3221_v47, %v3859_v14  ;;  %v839_v52 = vadd.f32 %v2758_v50, %v831_v49  ;;  %v3997_v47 = vld [vmem:[%s4511_s19 + $0x60] sm:$0xff] }
 0x1e8   : > { %v832_v51 = vmul.f32 %v2757_v46, %v824_v48 }
 0x1ea   : > { %v840_v53 = vadd.f32 %v2758_v50, %v832_v51 }
 0x1ec   : > { %v841_v54 = vpack.c.bf16 %v840_v53, %v839_v52  ;;  %v4005_v53 = vld [vmem:[%s4511_s19 + $0x78] sm:$0xff] }
 0x1ee   : > { %1052 = vmatmul.mubr.bf16.vlgmr.msra.gmra.mxu0 %v841_v54  ;;  %2972 = vmatmul.mubr.bf16.vlgmr.msra.gmra.mxu1 %v841_v54  ;;  %v4010_v54 = vld [vmem:[%s4511_s19 + $0x70] sm:$0xff] }
 0x2ae   : > { %v1053_v62 = vpop.f32.mrf.mxu0  ;;  %v1096_v63 = vpop.f32.mrf.mxu1 }
 0x2af   : > { %v1054_v4 = vadd.f32 %v1053_v62, %v879_v61  ;;  %v1097_v10 = vadd.f32 %v1096_v63, %v887_v0 }
 0x2b0   : > { %v1055_v2 = vpop.f32.mrf.mxu0  ;;  %v2973_v3 = vpop.f32.mrf.mxu1 }
 0x2b1   : > { %v1056_v13 = vadd.f32 %v1055_v2, %v883_v1  ;;  %v1119_v18 = vmul.f32 %v3920_v8, %v1054_v4  ;;  %v1121_v28 = vmul.f32 %v3942_v24, %v1054_v4  ;;  %v1123_v30 = vmul.f32 %v3948_v26, %v1054_v4 }
 0x2b2   : > { %v1057_v5 = vpop.f32.mrf.mxu0  ;;  %v1099_v7 = vpop.f32.mrf.mxu1  ;;  %v1125_v39 = vmul.f32 %v3967_v35, %v1054_v4  ;;  %v1127_v40 = vmul.f32 %v3973_v37, %v1054_v4  ;;  %v1129_v49 = vmul.f32 %v3991_v45, %v1054_v4  ;;  %v1131_v50 = vmul.f32 %v3997_v47, %v1054_v4 }
 0x2b3   : > { %v1058_v11 = vadd.f32 %v1057_v5, %v879_v61  ;;  %v1100_v12 = vadd.f32 %v1099_v7, %v887_v0  ;;  %v1133_v58 = vmul.f32 %v4010_v54, %v1054_v4  ;;  %v1257_v0 = vld [vmem:[%s4512_s0] sm:$0xff]  ;;  %v1259_v5 = vld [vmem:[%s4512_s0 + $0x10] sm:$0xff] }
 0x2b4   : > { %v1059_v14 = vpop.f32.mrf.mxu0  ;;  %v2974_v15 = vpop.f32.mrf.mxu1 }
 0x2b5   : > { %v1474_v16 = vpack.c.bf16 %v1100_v12, %v1097_v10  ;;  %v1060_v17 = vadd.f32 %v1059_v14, %v883_v1  ;;  %v1120_v19 = vmul.f32 %v3925_v9, %v1058_v11  ;;  %v1122_v25 = vmul.f32 %v3932_v22, %v1058_v11  ;;  %v1258_v10 = vld [vmem:[%s4512_s0 + $0x8] sm:$0xff] }
 0x2b6   : > { %v1124_v27 = vmul.f32 %v3937_v23, %v1058_v11  ;;  %v1126_v36 = vmul.f32 %v3957_v33, %v1058_v11  ;;  %v1128_v38 = vmul.f32 %v3962_v34, %v1058_v11  ;;  %v1130_v46 = vmul.f32 %v3981_v43, %v1058_v11 }
 0x2b7   : > { %v1143_v20 = vpack.c.bf16 %v1060_v17, %v1056_v13  ;;  %2993 = vmatprep.subr.bf16.mxu1 %v1474_v16  ;;  %v1135_v21 = vpack.c.bf16 %v1120_v19, %v1119_v18  ;;  %v1136_v31 = vpack.c.bf16 %v1122_v25, %v1121_v28  ;;  %v1132_v48 = vmul.f32 %v3986_v44, %v1058_v11 }
 0x2b8   : > { %2994 = vmatpush3.bf16.msra.mxu1 %v1474_v16  ;;  %v1137_v32 = vpack.c.bf16 %v1124_v27, %v1123_v30  ;;  %v1138_v41 = vpack.c.bf16 %v1126_v36, %v1125_v39  ;;  %v1139_v42 = vpack.c.bf16 %v1128_v38, %v1127_v40  ;;  %v1140_v51 = vpack.c.bf16 %v1130_v46, %v1129_v49  ;;  %v1260_v16 = vld [vmem:[%s4512_s0 + $0x18] sm:$0xff]  ;;  %v1263_v30 = vld [vmem:[%s4512_s0 + $0x30] sm:$0xff]  ;;  %v1262_v39 = vld [vmem:[%s4512_s0 + $0x28] sm:$0xff] }
 0x2b9   : > { %2975 = vmatprep.subr.bf16.mxu0 %v1143_v20  ;;  %2977 = vmatprep.mubr.bf16.mxu0 %v1135_v21  ;;  %v1141_v52 = vpack.c.bf16 %v1132_v48, %v1131_v50  ;;  %v1134_v55 = vmul.f32 %v4005_v53, %v1058_v11  ;;  %v1264_v49 = vld [vmem:[%s4512_s0 + $0x38] sm:$0xff] }
 0x2ba   : > { %2976 = vmatpush3.bf16.xpose.msra.mxu0 %v1143_v20  ;;  %v1261_v20 = vld [vmem:[%s4512_s0 + $0x20] sm:$0xff] }
 0x2bb   : > { %3011 = vmatprep.subr.bf16.mxu0 %v3478_v6  ;;  %v1142_v61 = vpack.c.bf16 %v1134_v55, %v1133_v58  ;;  %v1265_v55 = vld [vmem:[%s4512_s0 + $0x40] sm:$0xff] }
 0x2c1   : > { %2978 = vmatmul.mubr.bf16.vlgmr.msra.gmra.mxu0 %v1136_v31 }
 0x2c2   : > { %2981 = vmatprep.mubr.bf16.mxu0 %v1137_v32 }
 0x2c9   : > { %2982 = vmatmul.mubr.bf16.gmra.mxu0 %v1138_v41 }
 0x2ca   : > { %2985 = vmatprep.mubr.bf16.mxu0 %v1139_v42 }
 0x2d1   : > { %2986 = vmatmul.mubr.bf16.gmra.mxu0 %v1140_v51 }
 0x2d2   : > { %2989 = vmatprep.mubr.bf16.mxu0 %v1141_v52 }
 0x2d9   : > { %2990 = vmatmul.mubr.bf16.gmra.mxu0 %v1142_v61 }
 0x2da   : > { %3027 = vmatprep.mubr.msk.bf16.mxu0 %vm3480_vm0, %v3478_v6 }
 0x381   : > { %v2979_v62 = vpop.f32.mrf.mxu0 }
 0x382   : > { %v1243_v1 = vmul.f32 0.25, %v2979_v62 }
 0x383   : > { %v1178_v63 = vpop.f32.mrf.mxu0 }
 0x384   : > { %v1241_v2 = vmul.f32 0.25, %v1178_v63  ;;  %v4029_v14 = vadd.f32 %v1259_v5, %v1243_v1  ;;  %v1267_v1 = vld [vmem:[%s4512_s0 + $0x50] sm:$0xff] }
 0x385   : > { %v2980_v3 = vpop.f32.mrf.mxu0 }
 0x386   : > { %v4022_v7 = vadd.f32 %v1257_v0, %v1241_v2  ;;  %v1244_v11 = vmul.f32 0.25, %v2980_v3  ;;  %v1296_v25 = vsel %vm1289_vm1, %v4029_v14, -inf }
 0x387   : > { %v1181_v4 = vpop.f32.mrf.mxu0 }
 0x388   : > { %v1242_v12 = vmul.f32 0.25, %v1181_v4  ;;  %v1290_v13 = vsel %vm1289_vm1, %v4022_v7, -inf  ;;  %v4043_v28 = vadd.f32 %v1260_v16, %v1244_v11  ;;  %v1266_v4 = vld [vmem:[%s4512_s0 + $0x48] sm:$0xff] }
 0x389   : > { %1291 = vmax.xlane.f32.xlu0 %v1290_v13  ;;  %v2983_v15 = vpop.f32.mrf.mxu0 }
 0x38a   : > { %v4034_v17 = vadd.f32 %v1258_v10, %v1242_v12  ;;  %v1247_v18 = vmul.f32 0.25, %v2983_v15  ;;  %v1299_v42 = vsel %vm1289_vm1, %v4043_v28, -inf  ;;  %v1268_v15 = vld [vmem:[%s4512_s0 + $0x58] sm:$0xff] }
 0x38b   : > { %v1194_v19 = vpop.f32.mrf.mxu0 }
 0x38c   : > { %v1245_v21 = vmul.f32 0.25, %v1194_v19  ;;  %v1293_v27 = vsel %vm1289_vm1, %v4034_v17, -inf  ;;  %v4050_v38 = vadd.f32 %v1263_v30, %v1247_v18 }
 0x38d   : > { %1297 = vmax.xlane.f32.xlu0 %v1296_v25  ;;  %1294 = vmax.xlane.f32.xlu1 %v1293_v27  ;;  %v2984_v31 = vpop.f32.mrf.mxu0 }
 0x38e   : > { %v4048_v32 = vadd.f32 %v1261_v20, %v1245_v21  ;;  %v1248_v40 = vmul.f32 0.25, %v2984_v31  ;;  %v1308_v52 = vsel %vm1289_vm1, %v4050_v38, -inf  ;;  %v1269_v21 = vld [vmem:[%s4512_s0 + $0x60] sm:$0xff] }
 0x38f   : > { %v1197_v36 = vpop.f32.mrf.mxu0 }
 0x390   : > { %v1246_v41 = vmul.f32 0.25, %v1197_v36  ;;  %v1302_v46 = vsel %vm1289_vm1, %v4048_v32, -inf  ;;  %v4071_v63 = vadd.f32 %v1264_v49, %v1248_v40 }
 0x391   : > { %1300 = vmax.xlane.f32.xlu1 %v1299_v42  ;;  %1303 = vmax.xlane.f32.xlu0 %v1302_v46  ;;  %v2987_v48 = vpop.f32.mrf.mxu0  ;;  %v1270_v46 = vld [vmem:[%s4512_s0 + $0x68] sm:$0xff] }
 0x392   : > { %v4062_v50 = vadd.f32 %v1262_v39, %v1246_v41  ;;  %v1251_v58 = vmul.f32 0.25, %v2987_v48  ;;  %v1311_v11 = vsel %vm1289_vm1, %v4071_v63, -inf  ;;  %v1271_v39 = vld [vmem:[%s4512_s0 + $0x70] sm:$0xff] }
 0x393   : > { %v1210_v51 = vpop.f32.mrf.mxu0 }
 0x394   : > { %v1249_v61 = vmul.f32 0.25, %v1210_v51  ;;  %v1305_v62 = vsel %vm1289_vm1, %v4062_v50, -inf  ;;  %v4085_v13 = vadd.f32 %v1267_v1, %v1251_v58 }
 0x395   : > { %1309 = vmax.xlane.f32.xlu0 %v1308_v52  ;;  %1306 = vmax.xlane.f32.xlu1 %v1305_v62  ;;  %v2988_v0 = vpop.f32.mrf.mxu0 }
 0x396   : > { %v4076_v2 = vadd.f32 %v1265_v55, %v1249_v61  ;;  %v1252_v3 = vmul.f32 0.25, %v2988_v0  ;;  %v1320_v30 = vsel %vm1289_vm1, %v4085_v13, -inf  ;;  %v1272_v55 = vld [vmem:[%s4512_s0 + $0x78] sm:$0xff] }
 0x397   : > { %v1213_v5 = vpop.f32.mrf.mxu0 }
 0x398   : > { %v1250_v10 = vmul.f32 0.25, %v1213_v5  ;;  %v1314_v12 = vsel %vm1289_vm1, %v4076_v2, -inf  ;;  %v4092_v20 = vadd.f32 %v1268_v15, %v1252_v3 }
 0x399   : > { %1312 = vmax.xlane.f32.xlu1 %v1311_v11  ;;  %1315 = vmax.xlane.f32.xlu0 %v1314_v12  ;;  %v2991_v16 = vpop.f32.mrf.mxu0 }
 0x39a   : > { %v4090_v18 = vadd.f32 %v1266_v4, %v1250_v10  ;;  %v1255_v25 = vmul.f32 0.25, %v2991_v16  ;;  %v1323_v42 = vsel %vm1289_vm1, %v4092_v20, -inf }
 0x39b   : > { %v1226_v19 = vpop.f32.mrf.mxu0 }
 0x39c   : > { %v1253_v27 = vmul.f32 0.25, %v1226_v19  ;;  %v1317_v31 = vsel %vm1289_vm1, %v4090_v18, -inf  ;;  %v4113_v52 = vadd.f32 %v1271_v39, %v1255_v25 }
 0x39d   : > { %1321 = vmax.xlane.f32.xlu0 %v1320_v30  ;;  %1318 = vmax.xlane.f32.xlu1 %v1317_v31  ;;  %v2992_v36 = vpop.f32.mrf.mxu0 }
 0x39e   : > { %v4104_v40 = vadd.f32 %v1269_v21, %v1253_v27  ;;  %v1256_v48 = vmul.f32 0.25, %v2992_v36  ;;  %v1332_v61 = vsel %vm1289_vm1, %v4113_v52, -inf }
 0x39f   : > { %v1229_v41 = vpop.f32.mrf.mxu0 }
 0x3a0   : > { %v1254_v49 = vmul.f32 0.25, %v1229_v41  ;;  %v1326_v51 = vsel %vm1289_vm1, %v4104_v40, -inf  ;;  %v4124_v0 = vadd.f32 %v1272_v55, %v1256_v48 }
 0x3a1   : > { %1324 = vmax.xlane.f32.xlu1 %v1323_v42  ;;  %1327 = vmax.xlane.f32.xlu0 %v1326_v51 }
 0x3a2   : > { %v4118_v58 = vadd.f32 %v1270_v46, %v1254_v49  ;;  %v1335_v1 = vsel %vm1289_vm1, %v4124_v0, -inf }
 0x3a4   : > { %v1329_v62 = vsel %vm1289_vm1, %v4118_v58, -inf }
 0x3a5   : > { %1333 = vmax.xlane.f32.xlu0 %v1332_v61  ;;  %1330 = vmax.xlane.f32.xlu1 %v1329_v62 }
 0x3a9   : > { %1336 = vmax.xlane.f32.xlu1 %v1335_v1 }
 0x412   : > { %v1292_v3 = vpop.xlane.xlu0 %1291 }
 0x413   : > { %v1338_v5 = vsub.f32 %v4022_v7, %v1292_v3 }
 0x415   : > { %v1354_v4 = vmul.f32 1.442695, %v1338_v5 }
 0x416   : > { %v1298_v10 = vpop.xlane.xlu0 %1297  ;;  %v1295_v11 = vpop.xlane.xlu1 %1294 }
 0x417   : > { %3222 = vpow2.f32 %v1354_v4  ;;  %v1340_v12 = vsub.f32 %v4029_v14, %v1298_v10  ;;  %v1339_v15 = vsub.f32 %v4034_v17, %v1295_v11 }
 0x419   : > { %v1358_v16 = vmul.f32 1.442695, %v1340_v12  ;;  %v1356_v19 = vmul.f32 1.442695, %v1339_v15 }
 0x41a   : > { %v1301_v21 = vpop.xlane.xlu1 %1300  ;;  %v1304_v25 = vpop.xlane.xlu0 %1303 }
 0x41b   : > { %3224 = vpow2.f32 %v1358_v16  ;;  %v1341_v27 = vsub.f32 %v4043_v28, %v1301_v21  ;;  %v1342_v30 = vsub.f32 %v4048_v32, %v1304_v25 }
 0x41c   : > { %3226 = vpow2.f32 %v1356_v19 }
 0x41d   : > { %v1360_v31 = vmul.f32 1.442695, %v1341_v27  ;;  %v1362_v7 = vmul.f32 1.442695, %v1342_v30 }
 0x41e   : > { %v1310_v36 = vpop.xlane.xlu0 %1309  ;;  %v1307_v39 = vpop.xlane.xlu1 %1306 }
 0x41f   : > { %3228 = vpow2.f32 %v1360_v31  ;;  %v1344_v41 = vsub.f32 %v4050_v38, %v1310_v36  ;;  %v1343_v14 = vsub.f32 %v4062_v50, %v1307_v39 }
 0x420   : > { %3230 = vpow2.f32 %v1362_v7 }
 0x421   : > { %v1366_v17 = vmul.f32 1.442695, %v1344_v41  ;;  %v1364_v42 = vmul.f32 1.442695, %v1343_v14 }
 0x422   : > { %v1313_v46 = vpop.xlane.xlu1 %1312  ;;  %v1316_v48 = vpop.xlane.xlu0 %1315 }
 0x423   : > { %3232 = vpow2.f32 %v1366_v17  ;;  %v1345_v28 = vsub.f32 %v4071_v63, %v1313_v46  ;;  %v1346_v32 = vsub.f32 %v4076_v2, %v1316_v48 }
 0x424   : > { %v4137_v49 = vpop.eup %3222  ;;  %3234 = vpow2.f32 %v1364_v42 }
 0x425   : > { %v1368_v51 = vmul.f32 1.442695, %v1345_v28  ;;  %v1370_v55 = vmul.f32 1.442695, %v1346_v32  ;;  %v1386_v38 = vsel %vm1289_vm1, %v4137_v49, 0.0 }
 0x426   : > { %v1322_v61 = vpop.xlane.xlu0 %1321  ;;  %v1319_v50 = vpop.xlane.xlu1 %1318  ;;  %1387 = vadd.xlane.f32.xlu0 %v1386_v38 }
 0x427   : > { %3236 = vpow2.f32 %v1368_v51  ;;  %v1348_v62 = vsub.f32 %v4085_v13, %v1322_v61  ;;  %v1347_v1 = vsub.f32 %v4090_v18, %v1319_v50 }
 0x428   : > { %v4143_v3 = vpop.eup %3224  ;;  %3238 = vpow2.f32 %v1370_v55 }
 0x429   : > { %v4145_v63 = vpop.eup %3226  ;;  %v1374_v2 = vmul.f32 1.442695, %v1348_v62  ;;  %v1372_v5 = vmul.f32 1.442695, %v1347_v1  ;;  %v1392_v4 = vsel %vm1289_vm1, %v4143_v3, 0.0 }
 0x42a   : > { %v1325_v10 = vpop.xlane.xlu1 %1324  ;;  %1393 = vadd.xlane.f32.xlu0 %v1392_v4  ;;  %v1328_v11 = vpop.xlane.xlu0 %1327  ;;  %v1389_v12 = vsel %vm1289_vm1, %v4145_v63, 0.0 }
 0x42b   : > { %3240 = vpow2.f32 %v1374_v2  ;;  %v1349_v13 = vsub.f32 %v4092_v20, %v1325_v10  ;;  %v1350_v18 = vsub.f32 %v4104_v40, %v1328_v11  ;;  %1390 = vadd.xlane.f32.xlu1 %v1389_v12 }
 0x42c   : > { %v4153_v15 = vpop.eup %3228  ;;  %3242 = vpow2.f32 %v1372_v5 }
 0x42d   : > { %v4155_v16 = vpop.eup %3230  ;;  %v1376_v19 = vmul.f32 1.442695, %v1349_v13  ;;  %v1378_v21 = vmul.f32 1.442695, %v1350_v18  ;;  %v1395_v25 = vsel %vm1289_vm1, %v4153_v15, 0.0 }
 0x42e   : > { %v1398_v27 = vsel %vm1289_vm1, %v4155_v16, 0.0  ;;  %v1334_v30 = vpop.xlane.xlu0 %1333  ;;  %v1331_v31 = vpop.xlane.xlu1 %1330 }
 0x42f   : > { %3244 = vpow2.f32 %v1376_v19  ;;  %1399 = vadd.xlane.f32.xlu0 %v1398_v27  ;;  %v1352_v20 = vsub.f32 %v4113_v52, %v1334_v30  ;;  %1396 = vadd.xlane.f32.xlu1 %v1395_v25  ;;  %v1351_v40 = vsub.f32 %v4118_v58, %v1331_v31 }
 0x430   : > { %v4163_v7 = vpop.eup %3232  ;;  %3246 = vpow2.f32 %v1378_v21 }
 0x431   : > { %v4165_v36 = vpop.eup %3234  ;;  %v1382_v39 = vmul.f32 1.442695, %v1352_v20  ;;  %v1380_v41 = vmul.f32 1.442695, %v1351_v40  ;;  %v1404_v14 = vsel %vm1289_vm1, %v4163_v7, 0.0 }
 0x432   : > { %v1401_v17 = vsel %vm1289_vm1, %v4165_v36, 0.0  ;;  %v1337_v42 = vpop.xlane.xlu1 %1336 }
 0x433   : > { %3248 = vpow2.f32 %v1382_v39  ;;  %1405 = vadd.xlane.f32.xlu0 %v1404_v14  ;;  %1402 = vadd.xlane.f32.xlu1 %v1401_v17  ;;  %v1353_v52 = vsub.f32 %v4124_v0, %v1337_v42 }
 0x434   : > { %v4172_v58 = vpop.eup %3236  ;;  %3250 = vpow2.f32 %v1380_v41 }
 0x435   : > { %v4174_v46 = vpop.eup %3238  ;;  %v1384_v48 = vmul.f32 1.442695, %v1353_v52  ;;  %v1407_v28 = vsel %vm1289_vm1, %v4172_v58, 0.0 }
 0x436   : > { %v1410_v32 = vsel %vm1289_vm1, %v4174_v46, 0.0 }
 0x437   : > { %3252 = vpow2.f32 %v1384_v48  ;;  %1411 = vadd.xlane.f32.xlu0 %v1410_v32  ;;  %1408 = vadd.xlane.f32.xlu1 %v1407_v28 }
 0x438   : > { %v4180_v51 = vpop.eup %3240 }
 0x439   : > { %v4182_v55 = vpop.eup %3242  ;;  %v1416_v0 = vsel %vm1289_vm1, %v4180_v51, 0.0 }
 0x43a   : > { %v1413_v38 = vsel %vm1289_vm1, %v4182_v55, 0.0 }
 0x43b   : > { %1417 = vadd.xlane.f32.xlu0 %v1416_v0  ;;  %1414 = vadd.xlane.f32.xlu1 %v1413_v38 }
 0x43c   : > { %v4188_v61 = vpop.eup %3244 }
 0x43d   : > { %v4190_v50 = vpop.eup %3246  ;;  %v1419_v62 = vsel %vm1289_vm1, %v4188_v61, 0.0 }
 0x43e   : > { %v1422_v1 = vsel %vm1289_vm1, %v4190_v50, 0.0 }
 0x43f   : > { %1423 = vadd.xlane.f32.xlu0 %v1422_v1  ;;  %1420 = vadd.xlane.f32.xlu1 %v1419_v62 }
 0x440   : > { %v4196_v2 = vpop.eup %3248 }
 0x441   : > { %v4198_v5 = vpop.eup %3250  ;;  %v1428_v4 = vsel %vm1289_vm1, %v4196_v2, 0.0 }
 0x442   : > { %v1425_v10 = vsel %vm1289_vm1, %v4198_v5, 0.0 }
 0x443   : > { %1429 = vadd.xlane.f32.xlu0 %v1428_v4  ;;  %1426 = vadd.xlane.f32.xlu1 %v1425_v10 }
 0x444   : > { %v4204_v11 = vpop.eup %3252 }
 0x445   : > { %v1431_v12 = vsel %vm1289_vm1, %v4204_v11, 0.0 }
 0x447   : > { %1432 = vadd.xlane.f32.xlu1 %v1431_v12 }
 0x4af   : > { %v1388_v13 = vpop.xlane.xlu0 %1387 }
 0x4b0   : > { %3254 = vrcp.f32 %v1388_v13 }
 0x4b3   : > { %v1394_v18 = vpop.xlane.xlu0 %1393 }
 0x4b4   : > { %v1391_v19 = vpop.xlane.xlu1 %1390 }
 0x4b5   : > { %3256 = vrcp.f32 %v1391_v19 }
 0x4b6   : > { %3258 = vrcp.f32 %v1394_v18 }
 0x4b8   : > { %v1400_v21 = vpop.xlane.xlu0 %1399  ;;  %v1397_v25 = vpop.xlane.xlu1 %1396 }
 0x4b9   : > { %3260 = vrcp.f32 %v1397_v25 }
 0x4ba   : > { %3262 = vrcp.f32 %v1400_v21 }
 0x4bc   : > { %v1406_v27 = vpop.xlane.xlu0 %1405  ;;  %v1403_v30 = vpop.xlane.xlu1 %1402 }
 0x4bd   : > { %3264 = vrcp.f32 %v1403_v30  ;;  %v3255_v31 = vpop.eup %3254 }
 0x4be   : > { %3266 = vrcp.f32 %v1406_v27  ;;  %v1435_v41 = vmul.f32 %v3255_v31, %v4137_v49 }
 0x4c0   : > { %v1412_v20 = vpop.xlane.xlu0 %1411  ;;  %v1409_v40 = vpop.xlane.xlu1 %1408 }
 0x4c1   : > { %3268 = vrcp.f32 %v1409_v40 }
 0x4c2   : > { %v3257_v39 = vpop.eup %3256  ;;  %3270 = vrcp.f32 %v1412_v20 }
 0x4c3   : > { %v1437_v14 = vmul.f32 %v3257_v39, %v4145_v63  ;;  %v3259_v52 = vpop.eup %3258 }
 0x4c4   : > { %v1418_v17 = vpop.xlane.xlu0 %1417  ;;  %v1415_v42 = vpop.xlane.xlu1 %1414  ;;  %v1439_v38 = vmul.f32 %v3259_v52, %v4143_v3 }
 0x4c5   : > { %v1466_v48 = vpack.c.bf16 %v1437_v14, %v1435_v41  ;;  %3272 = vrcp.f32 %v1415_v42 }
 0x4c6   : > { %v3261_v28 = vpop.eup %3260  ;;  %3274 = vrcp.f32 %v1418_v17 }
 0x4c7   : > { %2995 = vmatprep.mubr.msk.bf16.mxu1 %vm1289_vm1, %v1466_v48  ;;  %v1441_v62 = vmul.f32 %v3261_v28, %v4153_v15  ;;  %v3263_v1 = vpop.eup %3262 }
 0x4c8   : > { %v1424_v32 = vpop.xlane.xlu0 %1423  ;;  %v1421_v0 = vpop.xlane.xlu1 %1420  ;;  %v1443_v12 = vmul.f32 %v3263_v1, %v4155_v16 }
 0x4c9   : > { %3276 = vrcp.f32 %v1421_v0  ;;  %v1467_v49 = vpack.c.bf16 %v1441_v62, %v1439_v38  ;;  %v3135_v0 = vld [vmem:[%s3777_s7 + $0x10] sm:$0xff]   ;;  %v3136_v38 = vld [vmem:[%s3777_s7 + $0x8] sm:$0xff]   ;;  %v3137_v62 = vld [vmem:[%s3777_s7] sm:$0xff]  }
 0x4ca   : > { %v3265_v63 = vpop.eup %3264  ;;  %3278 = vrcp.f32 %v1424_v32  ;;  %v3134_v32 = vld [vmem:[%s3777_s7 + $0x18] sm:$0xff]  }
 0x4cb   : > { %2996 = vmatmul.mubr.msk.bf16.vlgmr.msra.gmra.mxu1 %vm1289_vm1, %v1467_v49  ;;  %v1445_v13 = vmul.f32 %v3265_v63, %v4165_v36  ;;  %v3267_v18 = vpop.eup %3266 }
 0x4cc   : > { %v1430_v4 = vpop.xlane.xlu0 %1429  ;;  %v1427_v10 = vpop.xlane.xlu1 %1426  ;;  %v1447_v15 = vmul.f32 %v3267_v18, %v4163_v7 }
 0x4cd   : > { %3280 = vrcp.f32 %v1427_v10  ;;  %v1468_v19 = vpack.c.bf16 %v1445_v13, %v1443_v12 }
 0x4ce   : > { %v3269_v21 = vpop.eup %3268  ;;  %3282 = vrcp.f32 %v1430_v4 }
 0x4cf   : > { %2999 = vmatprep.mubr.msk.bf16.mxu1 %vm1289_vm1, %v1468_v19  ;;  %v1449_v25 = vmul.f32 %v3269_v21, %v4172_v58  ;;  %v3271_v27 = vpop.eup %3270 }
 0x4d0   : > { %v1433_v3 = vpop.xlane.xlu1 %1432  ;;  %v1451_v16 = vmul.f32 %v3271_v27, %v4174_v46 }
 0x4d1   : > { %3284 = vrcp.f32 %v1433_v3  ;;  %v1469_v30 = vpack.c.bf16 %v1449_v25, %v1447_v15 }
 0x4d2   : > { %v3273_v31 = vpop.eup %3272 }
 0x4d3   : > { %3000 = vmatmul.mubr.msk.bf16.gmra.mxu1 %vm1289_vm1, %v1469_v30  ;;  %v1453_v36 = vmul.f32 %v3273_v31, %v4182_v55  ;;  %v3275_v20 = vpop.eup %3274 }
 0x4d4   : > { %v1455_v41 = vmul.f32 %v3275_v20, %v4180_v51 }
 0x4d5   : > { %v1470_v40 = vpack.c.bf16 %v1453_v36, %v1451_v16 }
 0x4d6   : > { %v3277_v39 = vpop.eup %3276 }
 0x4d7   : > { %3003 = vmatprep.mubr.msk.bf16.mxu1 %vm1289_vm1, %v1470_v40  ;;  %v1457_v7 = vmul.f32 %v3277_v39, %v4188_v61  ;;  %v3279_v58 = vpop.eup %3278 }
 0x4d8   : > { %v1459_v46 = vmul.f32 %v3279_v58, %v4190_v50  ;;  %v3130_v50 = vld [vmem:[%s3777_s7 + $0x38] sm:$0xff]  }
 0x4d9   : > { %v1471_v14 = vpack.c.bf16 %v1457_v7, %v1455_v41  ;;  %3012 = vmatpush3.bf16.msra.mxu0 %v3130_v50 }
 0x4da   : > { %v3281_v17 = vpop.eup %3280  ;;  %3013 = vmatprep.subr.bf16.mxu0 %v3478_v6 }
 0x4db   : > { %v3283_v42 = vpop.eup %3282  ;;  %3004 = vmatmul.mubr.msk.bf16.gmra.mxu1 %vm1289_vm1, %v1471_v14  ;;  %v1461_v55 = vmul.f32 %v3281_v17, %v4198_v5  ;;  %v3131_v5 = vld [vmem:[%s3777_s7 + $0x30] sm:$0xff]  }
 0x4dc   : > { %v1463_v51 = vmul.f32 %v3283_v42, %v4196_v2  ;;  %v3132_v2 = vld [vmem:[%s3777_s7 + $0x28] sm:$0xff]  }
 0x4dd   : > { %v1472_v48 = vpack.c.bf16 %v1461_v55, %v1459_v46  ;;  %3014 = vmatpush3.bf16.msra.mxu0 %v3131_v5 }
 0x4de   : > { %v3285_v52 = vpop.eup %3284  ;;  %3015 = vmatprep.subr.bf16.mxu0 %v3478_v6 }
 0x4df   : > { %v1465_v61 = vmul.f32 %v3285_v52, %v4204_v11  ;;  %3007 = vmatprep.mubr.msk.bf16.mxu1 %vm1289_vm1, %v1472_v48  ;;  %v3133_v11 = vld [vmem:[%s3777_s7 + $0x20] sm:$0xff]  }
 0x4e1   : > { %v1473_v28 = vpack.c.bf16 %v1465_v61, %v1463_v51  ;;  %3016 = vmatpush3.bf16.msra.mxu0 %v3132_v2 }
 0x4e2   : > { %3017 = vmatprep.subr.bf16.mxu0 %v3478_v6 }
 0x4e3   : > { %3008 = vmatmul.mubr.msk.bf16.gmra.mxu1 %vm1289_vm1, %v1473_v28 }
 0x4e4   : > { %2028 = vmatprep.mubr.bf16.mxu1 %v3479_v29 }
 0x4e5   : > { %3018 = vmatpush3.bf16.msra.mxu0 %v3133_v11 }
 0x4e6   : > { %3019 = vmatprep.subr.bf16.mxu0 %v3478_v6 }
 0x4e9   : > { %3020 = vmatpush3.bf16.msra.mxu0 %v3134_v32  ;;  %v3307_v32 = vld [vmem:[%s4508_s30 + $0x8] sm:$0xff] }
 0x4ea   : > { %3021 = vmatprep.subr.bf16.mxu0 %v3478_v6 }
 0x4ed   : > { %3022 = vmatpush3.bf16.msra.mxu0 %v3135_v0 }
 0x4ee   : > { %3023 = vmatprep.subr.bf16.mxu0 %v3478_v6 }
 0x4f1   : > { %3024 = vmatpush3.bf16.msra.mxu0 %v3136_v38  ;;  %v3138_v38 = vld [vmem:[%s3783_s16 + $0xe0] ss:$16 sps:$4 sm:$0xff]  }
 0x4f2   : > { %3025 = vmatprep.subr.bf16.mxu0 %v3478_v6 }
 0x4f5   : > { %3026 = vmatpush3.bf16.msra.mxu0 %v3137_v62  ;;  %v3140_v62 = vld [vmem:[%s3783_s16 + $0xe4] ss:$16 sps:$4 sm:$0xff]  }
 0x4f6   : > { %1996 = vmatprep.subr.bf16.mxu1 %v3140_v62  ;;  %v3188_v62 = vld [vmem:[%s3785_s21 + $0x38] sm:$0xff]  }
 0x4f7   : > { %1997 = vmatpush1.bf16.msra.mxu1 %v3138_v38  ;;  %v3187_v38 = vld [vmem:[%s3785_s21 + $0xf8] sm:$0xff]  }
 0x58b   : > { %v2997_v1 = vpop.f32.mrf.mxu1 }
 0x58c   : > { %v1598_v21 = vmul.f32 %v2997_v1, %v3942_v24  ;;  %v3141_v1 = vld [vmem:[%s3783_s16 + $0xe8] ss:$16 sps:$4 sm:$0xff]  }
 0x58d   : > { %v1533_v49 = vpop.f32.mrf.mxu1 }
 0x58e   : > { %v1596_v18 = vmul.f32 %v1533_v49, %v3920_v8  ;;  %v3143_v49 = vld [vmem:[%s3783_s16 + $0xec] ss:$16 sps:$4 sm:$0xff]  }
 0x58f   : > { %v2998_v63 = vpop.f32.mrf.mxu1  ;;  %2039 = vmatprep.subr.bf16.mxu0 %v3143_v49  ;;  %v3190_v49 = vld [vmem:[%s3785_s21 + $0x70] sm:$0xff]  }
 0x590   : > { %v1612_v6 = vadd.f32 %v1598_v21, %v1596_v18  ;;  %v1599_v27 = vmul.f32 %v2998_v63, %v3932_v22 }
 0x591   : > { %v1536_v4 = vpop.f32.mrf.mxu1 }
 0x592   : > { %v1597_v3 = vmul.f32 %v1536_v4, %v3925_v9 }
 0x593   : > { %v3001_v10 = vpop.f32.mrf.mxu1 }
 0x594   : > { %v1619_v16 = vadd.f32 %v1599_v27, %v1597_v3  ;;  %v1602_v40 = vmul.f32 %v3001_v10, %v3967_v35  ;;  %v3146_v3 = vld [vmem:[%s3783_s16 + $0xc4] ss:$16 sps:$4 sm:$0xff]  }
 0x595   : > { %v1549_v12 = vpop.f32.mrf.mxu1  ;;  %1998 = vmatprep.subr.bf16.mxu1 %v3146_v3  ;;  %v3152_v27 = vld [vmem:[%s3783_s16 + $0xa4] ss:$16 sps:$4 sm:$0xff]  }
 0x596   : > { %v1600_v15 = vmul.f32 %v1549_v12, %v3948_v26  ;;  %v3199_v3 = vld [vmem:[%s3785_s21 + $0xe0] sm:$0xff]  }
 0x597   : > { %v3002_v13 = vpop.f32.mrf.mxu1 }
 0x598   : > { %v1613_v36 = vadd.f32 %v1612_v6, %v1600_v15  ;;  %v1603_v9 = vmul.f32 %v3002_v13, %v3957_v33  ;;  %v3149_v15 = vld [vmem:[%s3783_s16 + $0xcc] ss:$16 sps:$4 sm:$0xff]   ;;  %v3147_v6 = vld [vmem:[%s3783_s16 + $0xc8] ss:$16 sps:$4 sm:$0xff]  }
 0x599   : > { %v1552_v19 = vpop.f32.mrf.mxu1 }
 0x59a   : > { %v1601_v30 = vmul.f32 %v1552_v19, %v3937_v23  ;;  %v1614_v41 = vadd.f32 %v1613_v36, %v1602_v40  ;;  %v3158_v36 = vld [vmem:[%s3783_s16 + $0x84] ss:$16 sps:$4 sm:$0xff]   ;;  %v3156_v40 = vld [vmem:[%s3783_s16 + $0x80] ss:$16 sps:$4 sm:$0xff]  }
 0x59b   : > { %v3005_v25 = vpop.f32.mrf.mxu1 }
 0x59c   : > { %v1620_v8 = vadd.f32 %v1619_v16, %v1601_v30  ;;  %v1606_v23 = vmul.f32 %v3005_v25, %v3991_v45  ;;  %v3144_v25 = vld [vmem:[%s3783_s16 + $0xc0] ss:$16 sps:$4 sm:$0xff]   ;;  %v3155_v30 = vld [vmem:[%s3783_s16 + $0xac] ss:$16 sps:$4 sm:$0xff]   ;;  %v3153_v16 = vld [vmem:[%s3783_s16 + $0xa8] ss:$16 sps:$4 sm:$0xff]  }
 0x59d   : > { %v1565_v31 = vpop.f32.mrf.mxu1  ;;  %1999 = vmatpush1.bf16.msra.mxu1 %v3144_v25  ;;  %v3201_v25 = vld [vmem:[%s3785_s21 + $0xa0] sm:$0xff]  }
 0x59e   : > { %v1604_v39 = vmul.f32 %v1565_v31, %v3973_v37  ;;  %v1621_v22 = vadd.f32 %v1620_v8, %v1603_v9  ;;  %v3150_v31 = vld [vmem:[%s3783_s16 + $0xa0] ss:$16 sps:$4 sm:$0xff]   ;;  %2000 = vmatprep.subr.bf16.mxu1 %v3152_v27  ;;  %v3159_v8 = vld [vmem:[%s3783_s16 + $0x88] ss:$16 sps:$4 sm:$0xff]  }
 0x59f   : > { %v3006_v20 = vpop.f32.mrf.mxu1  ;;  %v3162_v9 = vld [vmem:[%s3783_s16 + $0x60] ss:$16 sps:$4 sm:$0xff]   ;;  %v3203_v27 = vld [vmem:[%s3785_s21 + $0xd8] sm:$0xff]  }
 0x5a0   : > { %v1615_v58 = vadd.f32 %v1614_v41, %v1604_v39  ;;  %v1607_v46 = vmul.f32 %v3006_v20, %v3981_v43  ;;  %v2791_v43 = vld [vmem:[%s4513_s11] ss:$0 sm:$0xff]  ;;  %v3161_v20 = vld [vmem:[%s3783_s16 + $0x8c] ss:$16 sps:$4 sm:$0xff]   ;;  %v3164_v39 = vld [vmem:[%s3783_s16 + $0x64] ss:$16 sps:$4 sm:$0xff]  }
 0x5a1   : > { %v1568_v24 = vpop.f32.mrf.mxu1  ;;  %2001 = vmatpush1.bf16.msra.mxu1 %v3150_v31  ;;  %v3165_v41 = vld [vmem:[%s3783_s16 + $0x68] ss:$16 sps:$4 sm:$0xff]  }
 0x5a2   : > { %v1605_v26 = vmul.f32 %v1568_v24, %v3962_v34  ;;  %v1616_v37 = vadd.f32 %v1615_v58, %v1606_v23  ;;  %2002 = vmatprep.subr.bf16.mxu1 %v3158_v36  ;;  %v3167_v24 = vld [vmem:[%s3783_s16 + $0x6c] ss:$16 sps:$4 sm:$0xff]   ;;  %v3168_v58 = vld [vmem:[%s3783_s16 + $0x40] ss:$16 sps:$4 sm:$0xff]   ;;  %v3176_v23 = vld [vmem:[%s3783_s16 + $0x24] ss:$16 sps:$4 sm:$0xff]  }
 0x5a3   : > { %v3009_v7 = vpop.f32.mrf.mxu1  ;;  %v3205_v31 = vld [vmem:[%s3785_s21 + $0x98] sm:$0xff]   ;;  %v3207_v36 = vld [vmem:[%s3785_s21 + $0xd0] sm:$0xff]  }
 0x5a4   : > { %v1622_v17 = vadd.f32 %v1621_v22, %v1605_v26  ;;  %v1610_v34 = vmul.f32 %v3009_v7, %v4010_v54  ;;  %v3170_v26 = vld [vmem:[%s3783_s16 + $0x44] ss:$16 sps:$4 sm:$0xff]   ;;  %v3173_v7 = vld [vmem:[%s3783_s16 + $0x4c] ss:$16 sps:$4 sm:$0xff]   ;;  %v3171_v22 = vld [vmem:[%s3783_s16 + $0x48] ss:$16 sps:$4 sm:$0xff]  }
 0x5a5   : > { %v1581_v14 = vpop.f32.mrf.mxu1  ;;  %2003 = vmatpush1.bf16.msra.mxu1 %v3156_v40  ;;  %v3209_v40 = vld [vmem:[%s3785_s21 + $0x90] sm:$0xff]  }
 0x5a6   : > { %v1608_v42 = vmul.f32 %v1581_v14, %v3997_v47  ;;  %v1623_v48 = vadd.f32 %v1622_v17, %v1607_v46  ;;  %2004 = vmatprep.subr.bf16.mxu1 %v3164_v39  ;;  %v3174_v14 = vld [vmem:[%s3783_s16 + $0x20] ss:$16 sps:$4 sm:$0xff]   ;;  %v3177_v17 = vld [vmem:[%s3783_s16 + $0x28] ss:$16 sps:$4 sm:$0xff]   ;;  %v3185_v46 = vld [vmem:[%s3783_s16 + $0xc] ss:$16 sps:$4 sm:$0xff]  }
 0x5a7   : > { %v3010_v35 = vpop.f32.mrf.mxu1  ;;  %v3211_v39 = vld [vmem:[%s3785_s21 + $0xc8] sm:$0xff]  }
 0x5a8   : > { %v1617_v52 = vadd.f32 %v1616_v37, %v1608_v42  ;;  %v1611_v51 = vmul.f32 %v3010_v35, %v4005_v53  ;;  %v3306_v53 = vld [vmem:[%s4508_s30] sm:$0xff]  ;;  %v3179_v42 = vld [vmem:[%s3783_s16 + $0x2c] ss:$16 sps:$4 sm:$0xff]  }
 0x5a9   : > { %v1584_v55 = vpop.f32.mrf.mxu1  ;;  %2005 = vmatpush1.bf16.msra.mxu1 %v3162_v9  ;;  %v3182_v35 = vld [vmem:[%s3783_s16 + $0x4] ss:$16 sps:$4 sm:$0xff]   ;;  %v3180_v37 = vld [vmem:[%s3783_s16] ss:$16 sps:$4 sm:$0xff]   ;;  %v3213_v9 = vld [vmem:[%s3785_s21 + $0x88] sm:$0xff]  }
 0x5aa   : > { %v1609_v33 = vmul.f32 %v1584_v55, %v3986_v44  ;;  %v1618_v28 = vadd.f32 %v1617_v52, %v1610_v34  ;;  %2006 = vmatprep.subr.bf16.mxu1 %v3170_v26  ;;  %v3183_v55 = vld [vmem:[%s3783_s16 + $0x8] ss:$16 sps:$4 sm:$0xff]   ;;  %v3215_v26 = vld [vmem:[%s3785_s21 + $0xc0] sm:$0xff]  }
 0x5ac   : > { %v1624_v61 = vadd.f32 %v1623_v48, %v1609_v33 }
 0x5ad   : > { %2007 = vmatpush1.bf16.msra.mxu1 %v3168_v58  ;;  %v3217_v58 = vld [vmem:[%s3785_s21 + $0x80] sm:$0xff]  }
 0x5ae   : > { %v1625_v45 = vadd.f32 %v1624_v61, %v1611_v51  ;;  %2008 = vmatprep.subr.bf16.mxu1 %v3176_v23 }
 0x5b0   : > { %v1626_v50 = vpack.c.bf16 %v1625_v45, %v1618_v28 }
 0x5b1   : > { %2009 = vmatpush1.bf16.msra.mxu1 %v3174_v14  ;;  %v1830_v14 = vsub.s32 3, %v3905_v56 }
 0x5b2   : > { %3028 = vmatmul.mubr.bf16.vlgmr.msra.gmra.mxu0 %v1626_v50  ;;  %2010 = vmatprep.subr.bf16.mxu1 %v3182_v35  ;;  %v2800_v50 = vld [vmem:[%s778_s18] ss:$0 sm:$0xff] }
 0x5b3   : > { %2071 = vmatprep.mubr.bf16.mxu0 %v3479_v29  ;;  %2040 = vmatpush1.bf16.msra.mxu0 %v3141_v1  ;;  %v3189_v1 = vld [vmem:[%s3785_s21 + $0xb8] sm:$0xff]  }
 0x5b4   : > { %2041 = vmatprep.subr.bf16.mxu0 %v3149_v15  ;;  %v3200_v15 = vld [vmem:[%s3785_s21 + $0x20] sm:$0xff]  }
 0x5b5   : > { %2011 = vmatpush1.bf16.msra.mxu1 %v3180_v37 }
 0x5b7   : > { %2042 = vmatpush1.bf16.msra.mxu0 %v3147_v6  ;;  %v3202_v6 = vld [vmem:[%s3785_s21 + $0x58] sm:$0xff]  }
 0x5b8   : > { %2043 = vmatprep.subr.bf16.mxu0 %v3155_v30  ;;  %v3204_v30 = vld [vmem:[%s3785_s21 + $0x18] sm:$0xff]  }
 0x5bb   : > { %2044 = vmatpush1.bf16.msra.mxu0 %v3153_v16  ;;  %v3206_v16 = vld [vmem:[%s3785_s21 + $0x50] sm:$0xff]  }
 0x5bc   : > { %2045 = vmatprep.subr.bf16.mxu0 %v3161_v20  ;;  %v3208_v20 = vld [vmem:[%s3785_s21 + $0x10] sm:$0xff]  }
 0x5bf   : > { %2046 = vmatpush1.bf16.msra.mxu0 %v3159_v8  ;;  %v3210_v8 = vld [vmem:[%s3785_s21 + $0x48] sm:$0xff]  }
 0x5c0   : > { %2047 = vmatprep.subr.bf16.mxu0 %v3167_v24  ;;  %v3212_v24 = vld [vmem:[%s3785_s21 + $0x8] sm:$0xff]  }
 0x5c3   : > { %2048 = vmatpush1.bf16.msra.mxu0 %v3165_v41  ;;  %v3214_v41 = vld [vmem:[%s3785_s21 + $0x40] sm:$0xff]  }
 0x5c4   : > { %2049 = vmatprep.subr.bf16.mxu0 %v3173_v7  ;;  %v3216_v7 = vld [vmem:[%s3785_s21] sm:$0xff]  }
 0x5c7   : > { %2050 = vmatpush1.bf16.msra.mxu0 %v3171_v22  ;;  %v1814_v22 = vld [vmem:[%s3825_s13] sm:$0xf] }
 0x5c8   : > { %2051 = vmatprep.subr.bf16.mxu0 %v3179_v42  ;;  %v1819_v23 = vrot.slane %v1814_v22, %v878_v57  ;;  %v1823_v42 = vrot.slane %v1814_v22, %v882_v60  ;;  %v1831_v35 = vrot.slane %v1814_v22, %v1830_v14 }
 0x5cb   : > { %2052 = vmatpush1.bf16.msra.mxu0 %v3177_v17  ;;  %v1827_v17 = vrot.slane %v1814_v22, %v886_v59 }
 0x5cc   : > { %2053 = vmatprep.subr.bf16.mxu0 %v3185_v46 }
 0x5cf   : > { %2054 = vmatpush1.bf16.msra.mxu0 %v3183_v55 }
 0x5d0   : > { %2933 = vmatprep.subr.bf16.mxu0 %v3187_v38 }
 0x672   : > { %v1732_v44 = vpop.f32.mrf.mxu0 }
 0x673   : > { %v1733_v47 = vadd.f32 %v2791_v43, %v1732_v44 }
 0x674   : > { %v3029_v54 = vpop.f32.mrf.mxu0 }
 0x675   : > { %v4273_v5 = vadd.f32 %v3306_v53, %v1733_v47  ;;  %v2801_v54 = vld [vmem:[%s4514_s24] ss:$0 sm:$0xff] }
 0x676   : > { %v1735_v2 = vpop.f32.mrf.mxu0 }
 0x677   : > { %v1736_v11 = vadd.f32 %v2791_v43, %v1735_v2  ;;  %1743 = vadd.xlane.f32.xlu0 %v4273_v5 }
 0x678   : > { %v3030_v29 = vpop.f32.mrf.mxu0 }
 0x679   : > { %v4279_v0 = vadd.f32 %v3307_v32, %v1736_v11  ;;  %v3186_v32 = vld [vmem:[%s3785_s21 + $0x78] sm:$0xff]  }
 0x67a   : > { %2911 = vmatprep.subr.bf16.mxu1 %v3186_v32 }
 0x67b   : > { %1745 = vadd.xlane.f32.xlu1 %v4279_v0 }
 0x700   : > { %v1744_v63 = vpop.xlane.xlu0 %1743 }
 0x701   : > { %v1747_v4 = vmul.f32 0.0078125, %v1744_v63  ;;  %v3191_v63 = vld [vmem:[%s3785_s21 + $0xf0] sm:$0xff]  }
 0x703   : > { %v4287_v10 = vsub.f32 %v4273_v5, %v1747_v4  ;;  %v3192_v4 = vld [vmem:[%s3785_s21 + $0x30] sm:$0xff]  }
 0x704   : > { %v1746_v12 = vpop.xlane.xlu1 %1745 }
 0x705   : > { %v1748_v13 = vmul.f32 0.0078125, %v1746_v12  ;;  %v1751_v18 = vmul.f32 %v4287_v10, %v4287_v10  ;;  %v3194_v12 = vld [vmem:[%s3785_s21 + $0x68] sm:$0xff]  }
 0x707   : > { %v4292_v19 = vsub.f32 %v4279_v0, %v1748_v13  ;;  %1753 = vadd.xlane.f32.xlu0 %v1751_v18  ;;  %v3195_v13 = vld [vmem:[%s3785_s21 + $0xe8] sm:$0xff]  }
 0x708   : > { %v3196_v18 = vld [vmem:[%s3785_s21 + $0x28] sm:$0xff]  }
 0x709   : > { %v1752_v21 = vmul.f32 %v4292_v19, %v4292_v19 }
 0x70b   : > { %1755 = vadd.xlane.f32.xlu1 %v1752_v21  ;;  %v3198_v21 = vld [vmem:[%s3785_s21 + $0x60] sm:$0xff]  }
 0x790   : > { %v1754_v52 = vpop.xlane.xlu0 %1753 }
 0x791   : > { %v1757_v33 = vmul.f32 0.0078125, %v1754_v52 }
 0x793   : > { %v1759_v48 = vadd.f32 1e-05, %v1757_v33 }
 0x794   : > { %v1756_v34 = vpop.xlane.xlu1 %1755 }
 0x795   : > { %3286 = vrsqrt.f32 %v1759_v48  ;;  %v1758_v51 = vmul.f32 0.0078125, %v1756_v34 }
 0x797   : > { %v1760_v61 = vadd.f32 1e-05, %v1758_v51 }
 0x799   : > { %3288 = vrsqrt.f32 %v1760_v61 }
 0x7a2   : > { %v3287_v28 = vpop.eup %3286 }
 0x7a3   : > { %v1763_v45 = vmul.f32 %v3287_v28, %v4287_v10  ;;  %v3193_v10 = vld [vmem:[%s3785_s21 + $0xb0] sm:$0xff]  }
 0x7a5   : > { %v1771_v47 = vmul.f32 %v2800_v50, %v1763_v45 }
 0x7a6   : > { %v3289_v43 = vpop.eup %3288 }
 0x7a7   : > { %v1764_v44 = vmul.f32 %v3289_v43, %v4292_v19  ;;  %v1779_v2 = vadd.f32 %v2801_v54, %v1771_v47  ;;  %v3197_v19 = vld [vmem:[%s3785_s21 + $0xa8] sm:$0xff]  }
 0x7a9   : > { %v1772_v53 = vmul.f32 %v2800_v50, %v1764_v44 }
 0x7ab   : > { %v1780_v11 = vadd.f32 %v2801_v54, %v1772_v53 }
 0x7ad   : > { %v1781_v29 = vpack.c.bf16 %v1780_v11, %v1779_v2 }
 0x7af   : > { %2029 = vmatmul.mubr.bf16.vlgmr.msra.gmra.mxu1 %v1781_v29  ;;  %2072 = vmatmul.mubr.bf16.vlgmr.msra.gmra.mxu0 %v1781_v29 }
 0x7b0   : > { %2912 = vmatpush3.bf16.msra.mxu1 %v3188_v62  ;;  %2934 = vmatpush3.bf16.msra.mxu0 %v3189_v1 }
 0x7b1   : > { %2913 = vmatprep.subr.bf16.mxu1 %v3190_v49  ;;  %2935 = vmatprep.subr.bf16.mxu0 %v3191_v63 }
 0x7b4   : > { %2914 = vmatpush3.bf16.msra.mxu1 %v3192_v4  ;;  %2936 = vmatpush3.bf16.msra.mxu0 %v3193_v10 }
 0x7b5   : > { %2915 = vmatprep.subr.bf16.mxu1 %v3194_v12  ;;  %2937 = vmatprep.subr.bf16.mxu0 %v3195_v13 }
 0x7b8   : > { %2916 = vmatpush3.bf16.msra.mxu1 %v3196_v18  ;;  %2938 = vmatpush3.bf16.msra.mxu0 %v3197_v19 }
 0x7b9   : > { %2917 = vmatprep.subr.bf16.mxu1 %v3198_v21  ;;  %2939 = vmatprep.subr.bf16.mxu0 %v3199_v3 }
 0x7bc   : > { %2918 = vmatpush3.bf16.msra.mxu1 %v3200_v15  ;;  %2940 = vmatpush3.bf16.msra.mxu0 %v3201_v25 }
 0x7bd   : > { %2919 = vmatprep.subr.bf16.mxu1 %v3202_v6  ;;  %2941 = vmatprep.subr.bf16.mxu0 %v3203_v27 }
 0x7c0   : > { %2920 = vmatpush3.bf16.msra.mxu1 %v3204_v30  ;;  %2942 = vmatpush3.bf16.msra.mxu0 %v3205_v31 }
 0x7c1   : > { %2921 = vmatprep.subr.bf16.mxu1 %v3206_v16  ;;  %2943 = vmatprep.subr.bf16.mxu0 %v3207_v36 }
 0x7c4   : > { %2922 = vmatpush3.bf16.msra.mxu1 %v3208_v20  ;;  %2944 = vmatpush3.bf16.msra.mxu0 %v3209_v40 }
 0x7c5   : > { %2923 = vmatprep.subr.bf16.mxu1 %v3210_v8  ;;  %2945 = vmatprep.subr.bf16.mxu0 %v3211_v39 }
 0x7c8   : > { %2924 = vmatpush3.bf16.msra.mxu1 %v3212_v24  ;;  %2946 = vmatpush3.bf16.msra.mxu0 %v3213_v9 }
 0x7c9   : > { %2925 = vmatprep.subr.bf16.mxu1 %v3214_v41  ;;  %2947 = vmatprep.subr.bf16.mxu0 %v3215_v26 }
 0x7cc   : > { %2926 = vmatpush3.bf16.msra.mxu1 %v3216_v7  ;;  %2948 = vmatpush3.bf16.msra.mxu0 %v3217_v58 }
 0x86f   : > { %v2030_v46 = vpop.f32.mrf.mxu1  ;;  %v2073_v37 = vpop.f32.mrf.mxu0 }
 0x870   : > { %v4376_v55 = vadd.f32 %v2030_v46, %v1819_v23  ;;  %v4378_v52 = vadd.f32 %v2073_v37, %v1827_v17 }
 0x871   : > { %v2032_v33 = vpop.f32.mrf.mxu1  ;;  %v2075_v48 = vpop.f32.mrf.mxu0 }
 0x872   : > { %v2090_v34 = vmul.f32 0.044715, %v4376_v55  ;;  %v2092_v51 = vmul.f32 0.044715, %v4378_v52  ;;  %v2033_v57 = vadd.f32 %v2032_v33, %v1823_v42  ;;  %v4382_v61 = vadd.f32 %v2075_v48, %v1831_v35 }
 0x873   : > { %v2034_v59 = vpop.f32.mrf.mxu1  ;;  %v2077_v28 = vpop.f32.mrf.mxu0  ;;  %v2082_v33 = vmul.f32 0.5, %v4376_v55 }
 0x874   : > { %v2098_v56 = vmul.f32 %v2090_v34, %v4376_v55  ;;  %v2100_v60 = vmul.f32 %v2092_v51, %v4378_v52  ;;  %v2091_v45 = vmul.f32 0.044715, %v2033_v57  ;;  %v2093_v50 = vmul.f32 0.044715, %v4382_v61 }
 0x875   : > { %v2035_v43 = vadd.f32 %v2034_v59, %v1819_v23  ;;  %v4387_v44 = vadd.f32 %v2077_v28, %v1827_v17  ;;  %v2036_v47 = vpop.f32.mrf.mxu1  ;;  %v2079_v54 = vpop.f32.mrf.mxu0  ;;  %v2083_v46 = vmul.f32 0.5, %v2033_v57 }
 0x876   : > { %v2106_v53 = vmul.f32 %v2098_v56, %v4376_v55  ;;  %v2108_v2 = vmul.f32 %v2100_v60, %v4378_v52  ;;  %v2099_v11 = vmul.f32 %v2091_v45, %v2033_v57  ;;  %v2101_v29 = vmul.f32 %v2093_v50, %v4382_v61 }
 0x877   : > { %v2094_v32 = vmul.f32 0.044715, %v2035_v43  ;;  %v2096_v38 = vmul.f32 0.044715, %v4387_v44  ;;  %v2037_v62 = vadd.f32 %v2036_v47, %v1823_v42  ;;  %v2080_v1 = vadd.f32 %v2079_v54, %v1831_v35 }
 0x878   : > { %v2114_v49 = vadd.f32 %v2106_v53, %v4376_v55  ;;  %v2116_v63 = vadd.f32 %v2108_v2, %v4378_v52  ;;  %v2107_v4 = vmul.f32 %v2099_v11, %v2033_v57  ;;  %v2109_v10 = vmul.f32 %v2101_v29, %v4382_v61 }
 0x879   : > { %v2102_v12 = vmul.f32 %v2094_v32, %v2035_v43  ;;  %v2104_v13 = vmul.f32 %v2096_v38, %v4387_v44  ;;  %v2095_v18 = vmul.f32 0.044715, %v2037_v62  ;;  %v2097_v19 = vmul.f32 0.044715, %v2080_v1 }
 0x87a   : > { %v2122_v21 = vmul.f32 0.7978846, %v2114_v49  ;;  %v2124_v3 = vmul.f32 0.7978846, %v2116_v63  ;;  %v2115_v15 = vadd.f32 %v2107_v4, %v2033_v57  ;;  %v2117_v16 = vadd.f32 %v2109_v10, %v4382_v61 }
 0x87b   : > { %v2110_v25 = vmul.f32 %v2102_v12, %v2035_v43  ;;  %v2112_v6 = vmul.f32 %v2104_v13, %v4387_v44  ;;  %v2103_v27 = vmul.f32 %v2095_v18, %v2037_v62  ;;  %v2105_v30 = vmul.f32 %v2097_v19, %v2080_v1 }
 0x87c   : > { %v2123_v31 = vmul.f32 0.7978846, %v2115_v15  ;;  %3290 = vtanh.f32 %v2122_v21  ;;  %v2125_v39 = vmul.f32 0.7978846, %v2117_v16  ;;  %v2086_v59 = vmul.f32 0.5, %v2035_v43 }
 0x87d   : > { %v2118_v36 = vadd.f32 %v2110_v25, %v2035_v43  ;;  %v2120_v20 = vadd.f32 %v2112_v6, %v4387_v44  ;;  %v2111_v40 = vmul.f32 %v2103_v27, %v2037_v62  ;;  %3292 = vtanh.f32 %v2124_v3 }
 0x87e   : > { %v2113_v8 = vmul.f32 %v2105_v30, %v2080_v1  ;;  %3294 = vtanh.f32 %v2123_v31  ;;  %v2087_v45 = vmul.f32 0.5, %v2037_v62  ;;  %v2088_v47 = vmul.f32 0.5, %v4387_v44 }
 0x87f   : > { %v2126_v24 = vmul.f32 0.7978846, %v2118_v36  ;;  %v2128_v9 = vmul.f32 0.7978846, %v2120_v20  ;;  %v2119_v41 = vadd.f32 %v2111_v40, %v2037_v62  ;;  %3296 = vtanh.f32 %v2125_v39 }
 0x880   : > { %v2121_v26 = vadd.f32 %v2113_v8, %v2080_v1  ;;  %v2085_v53 = vmul.f32 0.5, %v4382_v61  ;;  %v2089_v2 = vmul.f32 0.5, %v2080_v1  ;;  %v2084_v55 = vmul.f32 0.5, %v4378_v52  ;;  %v2834_v52 = vld [vmem:[%s788_s20] ss:$0 sm:$0xff] }
 0x881   : > { %3298 = vtanh.f32 %v2126_v24  ;;  %v2127_v7 = vmul.f32 0.7978846, %v2119_v41 }
 0x882   : > { %3300 = vtanh.f32 %v2128_v9  ;;  %v2129_v58 = vmul.f32 0.7978846, %v2121_v26 }
 0x883   : > { %3302 = vtanh.f32 %v2127_v7 }
 0x884   : > { %3304 = vtanh.f32 %v2129_v58 }
 0x889   : > { %v3291_v22 = vpop.eup %3290 }
 0x88a   : > { %v3293_v14 = vpop.eup %3292  ;;  %v2138_v28 = vadd.f32 1.0, %v3291_v22 }
 0x88b   : > { %v3295_v23 = vpop.eup %3294  ;;  %v2140_v54 = vadd.f32 1.0, %v3293_v14 }
 0x88c   : > { %v3297_v17 = vpop.eup %3296  ;;  %v2139_v37 = vadd.f32 1.0, %v3295_v23  ;;  %v2146_v63 = vmul.f32 %v2138_v28, %v2082_v33 }
 0x88d   : > { %v2141_v51 = vadd.f32 1.0, %v3297_v17  ;;  %v2148_v62 = vmul.f32 %v2140_v54, %v2084_v55 }
 0x88e   : > { %v3299_v42 = vpop.eup %3298  ;;  %v2147_v29 = vmul.f32 %v2139_v37, %v2083_v46 }
 0x88f   : > { %v3301_v35 = vpop.eup %3300  ;;  %v2142_v48 = vadd.f32 1.0, %v3299_v42  ;;  %v2149_v43 = vmul.f32 %v2141_v51, %v2085_v53 }
 0x890   : > { %v3303_v34 = vpop.eup %3302  ;;  %v2144_v56 = vadd.f32 1.0, %v3301_v35 }
 0x891   : > { %v3305_v60 = vpop.eup %3304  ;;  %v2143_v50 = vadd.f32 1.0, %v3303_v34  ;;  %v2150_v57 = vmul.f32 %v2142_v48, %v2086_v59 }
 0x892   : > { %v2145_v11 = vadd.f32 1.0, %v3305_v60  ;;  %v2152_v38 = vmul.f32 %v2144_v56, %v2088_v47 }
 0x893   : > { %v2151_v32 = vmul.f32 %v2143_v50, %v2087_v45  ;;  %v2154_v12 = vpack.c.bf16 %v2150_v57, %v2146_v63 }
 0x894   : > { %v2153_v49 = vmul.f32 %v2145_v11, %v2089_v2  ;;  %v2156_v44 = vpack.c.bf16 %v2152_v38, %v2148_v62 }
 0x895   : > { %v2155_v4 = vpack.c.bf16 %v2151_v32, %v2147_v29 }
 0x896   : > { %v2157_v10 = vpack.c.bf16 %v2153_v49, %v2149_v43 }
 0x897   : > { %2453 = vmatprep.mubr.bf16.mxu1 %v2155_v4 }
 0x898   : > { %2494 = vmatprep.mubr.bf16.mxu0 %v2157_v10  ;;  %2454 = vmatmul.mubr.bf16.vlgmr.msra.gmra.mxu1 %v2154_v12 }
 0x899   : > { %2495 = vmatmul.mubr.bf16.vlgmr.msra.gmra.mxu0 %v2156_v44 }
 0x958   : > { %v2927_v61 = vpop.f32.mrf.mxu1 }
 0x959   : > { %v2949_v1 = vpop.f32.mrf.mxu0 }
 0x95a   : > { %v2928_v13 = vpop.f32.mrf.mxu1 }
 0x95b   : > { %v2929_v18 = vadd.f32 %v2928_v13, %v2927_v61  ;;  %v2950_v19 = vpop.f32.mrf.mxu0 }
 0x95c   : > { %v2930_v21 = vpop.f32.mrf.mxu1  ;;  %v2951_v15 = vadd.f32 %v2950_v19, %v2949_v1 }
 0x95d   : > { %v2456_v3 = vadd.f32 %v2929_v18, %v2834_v52  ;;  %v2952_v25 = vpop.f32.mrf.mxu0 }
 0x95e   : > { %v2931_v6 = vpop.f32.mrf.mxu1 }
 0x95f   : > { %v2497_v27 = vadd.f32 %v2951_v15, %v2456_v3  ;;  %v2932_v30 = vadd.f32 %v2931_v6, %v2930_v21  ;;  %v2953_v31 = vpop.f32.mrf.mxu0 }
 0x960   : > { %v2954_v20 = vadd.f32 %v2953_v31, %v2952_v25 }
 0x961   : > { %v2503_v16 = vadd.f32 %v2497_v27, %v4273_v5  ;;  %v2459_v36 = vadd.f32 %v2932_v30, %v2834_v52 }
 0x963   : > { %2505 = vst [vmem:[%s4508_s30] sm:$0xff] %v2503_v16  ;;  %v2500_v40 = vadd.f32 %v2954_v20, %v2459_v36  ;;  %2510 = sbr.rel (%p2867_p9) target bundleno = 2726 (0xaa6), region = 112 }
 0x965   : > { %v2504_v8 = vadd.f32 %v2500_v40, %v4279_v0 }
 0x967   : > { %2506 = vst [vmem:[%s4508_s30 + $0x8] sm:$0xff] %v2504_v8 }
 0x968   : > { %v2868_v33 = vld [vmem:[%s4517_s22] ss:$0 sm:$0xff] }
 0x969   : > { %v2869_v34 = vld [vmem:[%s4518_s15] ss:$0 sm:$0xff] }
 0x96e   : > { %v2511_v5 = vld [vmem:[%s4516_s14] sm:$0xff]  ;;  %v2512_v39 = vld [vmem:[%s4516_s14 + $0x8] sm:$0xff] }
 0x96f   : > { %2515 = vadd.xlane.f32.xlu0 %v2511_v5 }
 0x973   : > { %2517 = vadd.xlane.f32.xlu0 %v2512_v39 }
 0x9f8   : > { %v2516_v24 = vpop.xlane.xlu0 %2515 }
 0x9f9   : > { %v2519_v9 = vmul.f32 0.0078125, %v2516_v24 }
 0x9fb   : > { %v2521_v0 = vsub.f32 %v2511_v5, %v2519_v9 }
 0x9fc   : > { %v2518_v41 = vpop.xlane.xlu0 %2517 }
 0x9fd   : > { %v2520_v26 = vmul.f32 0.0078125, %v2518_v41  ;;  %v2523_v7 = vmul.f32 %v2521_v0, %v2521_v0 }
 0x9ff   : > { %v2522_v58 = vsub.f32 %v2512_v39, %v2520_v26  ;;  %2525 = vadd.xlane.f32.xlu1 %v2523_v7 }
 0xa01   : > { %v2524_v22 = vmul.f32 %v2522_v58, %v2522_v58 }
 0xa03   : > { %2527 = vadd.xlane.f32.xlu1 %v2524_v22 }
 0xa88   : > { %v2526_v14 = vpop.xlane.xlu1 %2525 }
 0xa89   : > { %v2529_v23 = vmul.f32 0.0078125, %v2526_v14 }
 0xa8b   : > { %v2531_v17 = vadd.f32 1e-05, %v2529_v23 }
 0xa8c   : > { %v2528_v42 = vpop.xlane.xlu1 %2527 }
 0xa8d   : > { %3308 = vrsqrt.f32 %v2531_v17  ;;  %v2530_v35 = vmul.f32 0.0078125, %v2528_v42 }
 0xa8f   : > { %v2532_v46 = vadd.f32 1e-05, %v2530_v35 }
 0xa91   : > { %3310 = vrsqrt.f32 %v2532_v46 }
 0xa9a   : > { %v3309_v37 = vpop.eup %3308 }
 0xa9b   : > { %v2535_v48 = vmul.f32 %v3309_v37, %v2521_v0 }
 0xa9d   : > { %v2543_v51 = vmul.f32 %v2868_v33, %v2535_v48 }
 0xa9e   : > { %v3311_v59 = vpop.eup %3310 }
 0xa9f   : > { %v2551_v28 = vadd.f32 %v2869_v34, %v2543_v51  ;;  %v2536_v56 = vmul.f32 %v3311_v59, %v2522_v58 }
 0xaa1   : > { %2553 = vst [vmem:[%s4516_s14] sm:$0xff] %v2551_v28  ;;  %v2544_v60 = vmul.f32 %v2868_v33, %v2536_v56 }
 0xaa3   : > { %v2552_v45 = vadd.f32 %v2869_v34, %v2544_v60 }
 0xaa5   : > { %2554 = vst [vmem:[%s4516_s14 + $0x8] sm:$0xff] %v2552_v45 }
 0xaa6 PF: > { %s4519_s27 = sld [smem:[#allocation13_spill]]  ;;  %s4522_s24 = smov %s3458_s25 }
 0xaa7   : > { %s4520_s18 = sld [smem:[#allocation12_spill]] }
 0xaa8   : > { %s4521_s26 = sld [smem:[#allocation14_spill]] }
 0xaac   : > { %p33_p11 = scmp.ge.s32.totalorder %s4519_s27, 8  }
 0xaad   : > { %s4523_s25 = smov %s4520_s18 }
 0xaae   :  { %35 = sbr.rel (!%p33_p11) target bundleno = 19 (0x13), region = 193 }
 0xab3   :  { %2566 = vsyncpa [#allocation3], 1 }
 0xab4   :  { %2568 = vsyncpa [#allocation3 + $0x1], 1 }
 0xab5   :  { %2569 = vsyncpa [#allocation5], 1 }
 0xab6   :  { %2571 = vsyncpa [#allocation5 + $0x1], 1 }
 0xab7   :  { %2572 = vsyncpa [#allocation8], 1 }
 0xab8   :  { %2574 = vsyncpa [#allocation8 + $0x1], 1 }

</bundles_post_ra>
